<compile_context>
chip_gen: v5e
topology: v5e:2x2
jax: 0.10.0
libtpu: 0.0.40
codegen_flags: <defaults>
</compile_context>

<pallas_src>
import math

import jax
import jax.numpy as jnp
import numpy as np
from jax import lax
from jax.experimental import pallas as pl
from jax.experimental.pallas import tpu as pltpu

# Small, module-consistent shapes.
B, S, D = 2, 8, 32          # batch, seq, d_model
H = 4                        # heads
DK = D // H                  # d_k
HIDDEN = 64                  # feed-forward hidden size
N_LAYERS = 2                 # encoder depth N
N_ITEMS = 16                 # output vocabulary
EPS = 1e-6
LANES = 128                  # slab lane width (one vreg row)

# ---------------- packed weight-slab layout (static row offsets) ----------------
# Per-layer block (168 rows, all multiples of 8):
OFF_WQKV = 0                 # (D, 3D)       rows [0, 32)   lanes [0, 96)
OFF_WO = OFF_WQKV + D        # (D, D)        rows [32, 64)  lanes [0, 32)
OFF_W1 = OFF_WO + D          # (D, HIDDEN)   rows [64, 96)  lanes [0, 64)
OFF_W2 = OFF_W1 + D          # (HIDDEN, D)   rows [96, 160) lanes [0, 32)
OFF_VEC = OFF_W2 + HIDDEN    # 8-row block of 1-row vectors (biases / norm params)
LAYER_ROWS = OFF_VEC + 8     # 168
# row indices inside the per-layer vector block
VEC_N1A, VEC_N1B, VEC_BQKV, VEC_BO, VEC_N2A, VEC_N2B, VEC_B1, VEC_B2 = range(8)
# Final block:
FINAL_BASE = N_LAYERS * LAYER_ROWS         # 336
OFF_WOUT = FINAL_BASE                      # (D, N_ITEMS) rows [336, 368)
OFF_FVEC = FINAL_BASE + D                  # 8-row vector block
VEC_NA, VEC_NB, VEC_BOUT = 0, 1, 2
TOTAL_ROWS = OFF_FVEC + 8                  # 376 (multiple of 8)


def _norm(x, alpha, bias):
    # torch.std() uses the unbiased estimator (divide by n-1) -> reproduce it.
    # Exact divide (review correctness note); the norm is not on the MXU path.
    n = x.shape[-1]
    mean = jnp.mean(x, axis=-1, keepdims=True)
    var = jnp.sum((x - mean) ** 2, axis=-1, keepdims=True) * (1.0 / (n - 1))
    return alpha * (x - mean) / (jnp.sqrt(var) + EPS) + bias


def transformer_kernel(x_ref, w_ref, o_ref, att_ref):
    x = x_ref[...]                                   # (B*S, D), float32
    scale = 1.0 / math.sqrt(DK)

    for l in range(N_LAYERS):                        # static unroll over depth
        base = l * LAYER_ROWS
        vec = base + OFF_VEC
        # -- static views into the single packed slab (free ref slices) --
        wqkv = w_ref[base + OFF_WQKV: base + OFF_WQKV + D, 0:3 * D]     # (32, 96)
        wo = w_ref[base + OFF_WO: base + OFF_WO + D, 0:D]               # (32, 32)
        w1 = w_ref[base + OFF_W1: base + OFF_W1 + D, 0:HIDDEN]          # (32, 64)
        w2 = w_ref[base + OFF_W2: base + OFF_W2 + HIDDEN, 0:D]          # (64, 32)
        n1a = w_ref[vec + VEC_N1A: vec + VEC_N1A + 1, 0:D]
        n1b = w_ref[vec + VEC_N1B: vec + VEC_N1B + 1, 0:D]
        bqkv = w_ref[vec + VEC_BQKV: vec + VEC_BQKV + 1, 0:3 * D]
        bo = w_ref[vec + VEC_BO: vec + VEC_BO + 1, 0:D]
        n2a = w_ref[vec + VEC_N2A: vec + VEC_N2A + 1, 0:D]
        n2b = w_ref[vec + VEC_N2B: vec + VEC_N2B + 1, 0:D]
        b1 = w_ref[vec + VEC_B1: vec + VEC_B1 + 1, 0:HIDDEN]
        b2 = w_ref[vec + VEC_B2: vec + VEC_B2 + 1, 0:D]

        # ---- multi-head self-attention with pre-norm ----
        x2 = _norm(x, n1a, n1b)
        qkv = jnp.dot(x2, wqkv, preferred_element_type=jnp.float32) + bqkv  # (16, 96)

        # One lane slice per (head, q/k/v), covering both batches at once.
        q_h = [qkv[:, h * DK:(h + 1) * DK] for h in range(H)]           # (16, 8) each
        k_h = [qkv[:, D + h * DK: D + (h + 1) * DK] for h in range(H)]
        v_h = [qkv[:, 2 * D + h * DK: 2 * D + (h + 1) * DK] for h in range(H)]

        # Scores for every (h, b): contract LAST dims (no explicit transpose).
        s_parts = []
        for h in range(H):                           # static unroll
            for b in range(B):
                qb = q_h[h][b * S:(b + 1) * S, :]    # sublane slice, free
                kb = k_h[h][b * S:(b + 1) * S, :]
                s_parts.append(lax.dot_general(
                    qb, kb, (((1,), (1,)), ((), ())),
                    preferred_element_type=jnp.float32))                # (8, 8)
        s_all = jnp.concatenate(s_parts, axis=0) * scale                # (64, 8)

        # Batched softmax: one max/exp/sum/reciprocal chain per layer.
        s_all = s_all - jnp.max(s_all, axis=-1, keepdims=True)
        e = jnp.exp(s_all)
        p_all = e * pl.reciprocal(jnp.sum(e, axis=-1, keepdims=True), approx=True)

        # P @ V per (h, b); scatter each head output into the (16, 32) scratch
        # at its static lane offset, then ONE projection matmul per layer.
        idx = 0
        for h in range(H):
            for b in range(B):
                p = p_all[idx * S:(idx + 1) * S, :]                  # (8, 8), free slice
                vb = v_h[h][b * S:(b + 1) * S, :]                    # (8, 8), free slice
                oh = jnp.dot(p, vb, preferred_element_type=jnp.float32)
                att_ref[b * S:(b + 1) * S, h * DK:(h + 1) * DK] = oh  # masked vst
                idx += 1
        attn_out = jnp.dot(att_ref[...], wo,
                           preferred_element_type=jnp.float32) + bo     # (16, 32)
        x = x + attn_out                              # residual 1 (dropout = identity)

        # ---- feed-forward with pre-norm ----
        x2 = _norm(x, n2a, n2b)
        h1 = jnp.dot(x2, w1, preferred_element_type=jnp.float32) + b1
        h1 = jnp.maximum(h1, 0.0)                     # ReLU (dropout = identity)
        ff = jnp.dot(h1, w2, preferred_element_type=jnp.float32) + b2
        x = x + ff                                    # residual 2

    # ---- final Norm -> mean over seq (dim=-2) -> output Linear ----
    na = w_ref[OFF_FVEC + VEC_NA: OFF_FVEC + VEC_NA + 1, 0:D]
    nb = w_ref[OFF_FVEC + VEC_NB: OFF_FVEC + VEC_NB + 1, 0:D]
    wout = w_ref[OFF_WOUT: OFF_WOUT + D, 0:N_ITEMS]
    bout = w_ref[OFF_FVEC + VEC_BOUT: OFF_FVEC + VEC_BOUT + 1, 0:N_ITEMS]

    xn = _norm(x, na, nb)                             # (B*S, D)
    means = [jnp.mean(xn[b * S:(b + 1) * S, :], axis=0, keepdims=True)
             for b in range(B)]
    m = jnp.concatenate(means, axis=0)                # (B, D)
    o_ref[...] = jnp.dot(m, wout, preferred_element_type=jnp.float32) + bout


def transformer_forward(x, slab):
    # Flatten (B, S, D) -> (B*S, D) outside the kernel (free in XLA) so all
    # matmuls inside the kernel see the full 16-row slab.
    x2d = x.reshape(B * S, D)
    # Single program, no grid: two whole-array VMEM-resident inputs (activation
    # + one packed weight slab -> exactly 2 input DMAs), one kernel launch.
    return pl.pallas_call(
        transformer_kernel,
        out_shape=jax.ShapeDtypeStruct((B, N_ITEMS), jnp.float32),
        scratch_shapes=[pltpu.VMEM((B * S, D), jnp.float32)],
    )(x2d, slab)


# ---------------- deterministic parameter init ----------------
def init_params(key):
    def dense(key, fan_in, fan_out):
        k1, k2 = jax.random.split(key)
        w = jax.random.normal(k1, (fan_in, fan_out), jnp.float32) / math.sqrt(fan_in)
        b = 0.01 * jax.random.normal(k2, (1, fan_out), jnp.float32)
        return w, b

    layers = []
    for _ in range(N_LAYERS):
        keys = jax.random.split(key, 7)
        key = keys[0]
        wq, bq = dense(keys[1], D, D)
        wk, bk = dense(keys[2], D, D)
        wv, bv = dense(keys[3], D, D)
        wo, bo = dense(keys[4], D, D)
        w1, b1 = dense(keys[5], D, HIDDEN)
        w2, b2 = dense(keys[6], HIDDEN, D)
        layers.append(dict(
            n1a=jnp.ones((1, D), jnp.float32), n1b=jnp.zeros((1, D), jnp.float32),
            wq=wq, bq=bq, wk=wk, bk=bk, wv=wv, bv=bv, wo=wo, bo=bo,
            n2a=jnp.ones((1, D), jnp.float32), n2b=jnp.zeros((1, D), jnp.float32),
            w1=w1, b1=b1, w2=w2, b2=b2))
    k1, k2 = jax.random.split(key)
    wout, bout = dense(k2, D, N_ITEMS)
    return dict(
        layers=layers,
        na=jnp.ones((1, D), jnp.float32), nb=jnp.zeros((1, D), jnp.float32),
        wout=wout, bout=bout)


def pack_params(params):
    """Pack ALL weights/biases into one lane-dense (TOTAL_ROWS, 128) f32 slab."""
    slab = np.zeros((TOTAL_ROWS, LANES), np.float32)
    for l, p in enumerate(params["layers"]):
        base = l * LAYER_ROWS
        wqkv = np.concatenate(
            [np.asarray(p["wq"]), np.asarray(p["wk"]), np.asarray(p["wv"])], axis=1)
        bqkv = np.concatenate(
            [np.asarray(p["bq"]), np.asarray(p["bk"]), np.asarray(p["bv"])], axis=1)
        slab[base + OFF_WQKV: base + OFF_WQKV + D, :3 * D] = wqkv
        slab[base + OFF_WO: base + OFF_WO + D, :D] = np.asarray(p["wo"])
        slab[base + OFF_W1: base + OFF_W1 + D, :HIDDEN] = np.asarray(p["w1"])
        slab[base + OFF_W2: base + OFF_W2 + HIDDEN, :D] = np.asarray(p["w2"])
        vec = base + OFF_VEC
        slab[vec + VEC_N1A, :D] = np.asarray(p["n1a"]).reshape(-1)
        slab[vec + VEC_N1B, :D] = np.asarray(p["n1b"]).reshape(-1)
        slab[vec + VEC_BQKV, :3 * D] = bqkv.reshape(-1)
        slab[vec + VEC_BO, :D] = np.asarray(p["bo"]).reshape(-1)
        slab[vec + VEC_N2A, :D] = np.asarray(p["n2a"]).reshape(-1)
        slab[vec + VEC_N2B, :D] = np.asarray(p["n2b"]).reshape(-1)
        slab[vec + VEC_B1, :HIDDEN] = np.asarray(p["b1"]).reshape(-1)
        slab[vec + VEC_B2, :D] = np.asarray(p["b2"]).reshape(-1)
    slab[OFF_WOUT: OFF_WOUT + D, :N_ITEMS] = np.asarray(params["wout"])
    slab[OFF_FVEC + VEC_NA, :D] = np.asarray(params["na"]).reshape(-1)
    slab[OFF_FVEC + VEC_NB, :D] = np.asarray(params["nb"]).reshape(-1)
    slab[OFF_FVEC + VEC_BOUT, :N_ITEMS] = np.asarray(params["bout"]).reshape(-1)
    return jnp.asarray(slab)


# ---------------- pure-JAX reference (mirrors the PyTorch forward) ----------------
def ref_forward(x, params):
    def norm(x, a, b):
        mean = jnp.mean(x, -1, keepdims=True)
        var = jnp.sum((x - mean) ** 2, -1, keepdims=True) / (x.shape[-1] - 1)
        return a * (x - mean) / (jnp.sqrt(var) + EPS) + b

    for p in params["layers"]:
        x2 = norm(x, p["n1a"], p["n1b"])
        q = x2 @ p["wq"] + p["bq"]
        k = x2 @ p["wk"] + p["bk"]
        v = x2 @ p["wv"] + p["bv"]
        qh = q.reshape(B, S, H, DK).transpose(0, 2, 1, 3)
        kh = k.reshape(B, S, H, DK).transpose(0, 2, 1, 3)
        vh = v.reshape(B, S, H, DK).transpose(0, 2, 1, 3)
        sc = jnp.einsum("bhqd,bhkd->bhqk", qh, kh) / math.sqrt(DK)
        att = jax.nn.softmax(sc, axis=-1)
        o = jnp.einsum("bhqk,bhkd->bhqd", att, vh).transpose(0, 2, 1, 3).reshape(B, S, D)
        x = x + (o @ p["wo"] + p["bo"])
        x2 = norm(x, p["n2a"], p["n2b"])
        x = x + (jnp.maximum(x2 @ p["w1"] + p["b1"], 0.0) @ p["w2"] + p["b2"])
    xn = norm(x, params["na"], params["nb"])
    m = jnp.mean(xn, axis=1)
    return m @ params["wout"] + params["bout"]


if __name__ == "__main__":
    key = jax.random.PRNGKey(0)
    kx, kp = jax.random.split(key)
    x = jax.random.normal(kx, (B, S, D), jnp.float32)
    params = init_params(kp)
    slab = pack_params(params)

    out = transformer_forward(x, slab)
    out = jax.block_until_ready(out)

    ref = jax.block_until_ready(ref_forward(x, params))
    assert out.shape == (B, N_ITEMS)
    assert bool(jnp.all(jnp.isfinite(out)))
    np.testing.assert_allclose(np.asarray(out), np.asarray(ref),
                               rtol=5e-2, atol=5e-2)
    print("KERNEL_OK")
</pallas_src>

<mosaic_0001>
module attributes {stable_mosaic.version = 11 : i64} {
  func.func @transformer_kernel(%arg0: memref<16x32xf32, #tpu.memory_space<vmem>>, %arg1: memref<376x128xf32, #tpu.memory_space<vmem>>, %arg2: memref<2x16xf32, #tpu.memory_space<vmem>>, %arg3: memref<16x32xf32, #tpu.memory_space<vmem>>) attributes {dimension_semantics = [], scalar_prefetch = 0 : i64, scratch_operands = 1 : i64, tpu.core_type = #tpu.core_type<tc>} {
    %c0 = arith.constant 0 : index
    %c0_0 = arith.constant 0 : index
    %0 = vector.load %arg0[%c0, %c0_0] : memref<16x32xf32, #tpu.memory_space<vmem>>, vector<16x32xf32>
    %c0_1 = arith.constant 0 : index
    %c0_2 = arith.constant 0 : index
    %1 = vector.load %arg1[%c0_1, %c0_2] : memref<376x128xf32, #tpu.memory_space<vmem>>, vector<32x96xf32>
    %c32 = arith.constant 32 : index
    %c0_3 = arith.constant 0 : index
    %2 = vector.load %arg1[%c32, %c0_3] : memref<376x128xf32, #tpu.memory_space<vmem>>, vector<32x32xf32>
    %c64 = arith.constant 64 : index
    %c0_4 = arith.constant 0 : index
    %3 = vector.load %arg1[%c64, %c0_4] : memref<376x128xf32, #tpu.memory_space<vmem>>, vector<32x64xf32>
    %c96 = arith.constant 96 : index
    %c0_5 = arith.constant 0 : index
    %4 = vector.load %arg1[%c96, %c0_5] : memref<376x128xf32, #tpu.memory_space<vmem>>, vector<64x32xf32>
    %c160 = arith.constant 160 : index
    %c0_6 = arith.constant 0 : index
    %5 = vector.load %arg1[%c160, %c0_6] : memref<376x128xf32, #tpu.memory_space<vmem>>, vector<1x32xf32>
    %c161 = arith.constant 161 : index
    %c0_7 = arith.constant 0 : index
    %6 = vector.load %arg1[%c161, %c0_7] : memref<376x128xf32, #tpu.memory_space<vmem>>, vector<1x32xf32>
    %c162 = arith.constant 162 : index
    %c0_8 = arith.constant 0 : index
    %7 = vector.load %arg1[%c162, %c0_8] : memref<376x128xf32, #tpu.memory_space<vmem>>, vector<1x96xf32>
    %c163 = arith.constant 163 : index
    %c0_9 = arith.constant 0 : index
    %8 = vector.load %arg1[%c163, %c0_9] : memref<376x128xf32, #tpu.memory_space<vmem>>, vector<1x32xf32>
    %c164 = arith.constant 164 : index
    %c0_10 = arith.constant 0 : index
    %9 = vector.load %arg1[%c164, %c0_10] : memref<376x128xf32, #tpu.memory_space<vmem>>, vector<1x32xf32>
    %c165 = arith.constant 165 : index
    %c0_11 = arith.constant 0 : index
    %10 = vector.load %arg1[%c165, %c0_11] : memref<376x128xf32, #tpu.memory_space<vmem>>, vector<1x32xf32>
    %c166 = arith.constant 166 : index
    %c0_12 = arith.constant 0 : index
    %11 = vector.load %arg1[%c166, %c0_12] : memref<376x128xf32, #tpu.memory_space<vmem>>, vector<1x64xf32>
    %c167 = arith.constant 167 : index
    %c0_13 = arith.constant 0 : index
    %12 = vector.load %arg1[%c167, %c0_13] : memref<376x128xf32, #tpu.memory_space<vmem>>, vector<1x32xf32>
    %cst = arith.constant dense<0.000000e+00> : vector<16xf32>
    %13 = vector.multi_reduction <add>, %0, %cst [1] : vector<16x32xf32> to vector<16xf32>
    %14 = vector.shape_cast %13 : vector<16xf32> to vector<16x1xf32>
    %cst_14 = arith.constant 3.200000e+01 : f32
    %15 = vector.broadcast %cst_14 : f32 to vector<16x1xf32>
    %16 = arith.divf %14, %15 : vector<16x1xf32>
    %17 = vector.broadcast %16 : vector<16x1xf32> to vector<16x32xf32>
    %18 = arith.subf %0, %17 : vector<16x32xf32>
    %19 = arith.mulf %18, %18 : vector<16x32xf32>
    %cst_15 = arith.constant dense<0.000000e+00> : vector<16xf32>
    %20 = vector.multi_reduction <add>, %19, %cst_15 [1] : vector<16x32xf32> to vector<16xf32>
    %21 = vector.shape_cast %20 : vector<16xf32> to vector<16x1xf32>
    %cst_16 = arith.constant 0.0322580636 : f32
    %22 = vector.broadcast %cst_16 : f32 to vector<16x1xf32>
    %23 = arith.mulf %21, %22 : vector<16x1xf32>
    %24 = vector.broadcast %16 : vector<16x1xf32> to vector<16x32xf32>
    %25 = arith.subf %0, %24 : vector<16x32xf32>
    %26 = vector.broadcast %5 : vector<1x32xf32> to vector<16x32xf32>
    %27 = arith.mulf %26, %25 : vector<16x32xf32>
    %28 = math.sqrt %23 : vector<16x1xf32>
    %cst_17 = arith.constant 9.99999997E-7 : f32
    %29 = vector.broadcast %cst_17 : f32 to vector<16x1xf32>
    %30 = arith.addf %28, %29 : vector<16x1xf32>
    %31 = vector.broadcast %30 : vector<16x1xf32> to vector<16x32xf32>
    %32 = arith.divf %27, %31 : vector<16x32xf32>
    %33 = vector.broadcast %6 : vector<1x32xf32> to vector<16x32xf32>
    %34 = arith.addf %32, %33 : vector<16x32xf32>
    %cst_18 = arith.constant dense<0.000000e+00> : vector<16x96xf32>
    %35 = tpu.matmul %34, %1, %cst_18 {dimension_numbers = #tpu.dot_dimension_numbers<[1], [0], [0], [1], [0, 0, 1, 1], [], []>} : vector<16x32xf32>, vector<32x96xf32>, vector<16x96xf32> -> vector<16x96xf32>
    %36 = vector.broadcast %7 : vector<1x96xf32> to vector<16x96xf32>
    %37 = arith.addf %35, %36 : vector<16x96xf32>
    %38 = vector.extract_strided_slice %37 {offsets = [0, 0], sizes = [16, 8], strides = [1, 1]} : vector<16x96xf32> to vector<16x8xf32>
    %39 = vector.extract_strided_slice %37 {offsets = [0, 8], sizes = [16, 8], strides = [1, 1]} : vector<16x96xf32> to vector<16x8xf32>
    %40 = vector.extract_strided_slice %37 {offsets = [0, 16], sizes = [16, 8], strides = [1, 1]} : vector<16x96xf32> to vector<16x8xf32>
    %41 = vector.extract_strided_slice %37 {offsets = [0, 24], sizes = [16, 8], strides = [1, 1]} : vector<16x96xf32> to vector<16x8xf32>
    %42 = vector.extract_strided_slice %37 {offsets = [0, 32], sizes = [16, 8], strides = [1, 1]} : vector<16x96xf32> to vector<16x8xf32>
    %43 = vector.extract_strided_slice %37 {offsets = [0, 40], sizes = [16, 8], strides = [1, 1]} : vector<16x96xf32> to vector<16x8xf32>
    %44 = vector.extract_strided_slice %37 {offsets = [0, 48], sizes = [16, 8], strides = [1, 1]} : vector<16x96xf32> to vector<16x8xf32>
    %45 = vector.extract_strided_slice %37 {offsets = [0, 56], sizes = [16, 8], strides = [1, 1]} : vector<16x96xf32> to vector<16x8xf32>
    %46 = vector.extract_strided_slice %37 {offsets = [0, 64], sizes = [16, 8], strides = [1, 1]} : vector<16x96xf32> to vector<16x8xf32>
    %47 = vector.extract_strided_slice %37 {offsets = [0, 72], sizes = [16, 8], strides = [1, 1]} : vector<16x96xf32> to vector<16x8xf32>
    %48 = vector.extract_strided_slice %37 {offsets = [0, 80], sizes = [16, 8], strides = [1, 1]} : vector<16x96xf32> to vector<16x8xf32>
    %49 = vector.extract_strided_slice %37 {offsets = [0, 88], sizes = [16, 8], strides = [1, 1]} : vector<16x96xf32> to vector<16x8xf32>
    %50 = vector.extract_strided_slice %38 {offsets = [0, 0], sizes = [8, 8], strides = [1, 1]} : vector<16x8xf32> to vector<8x8xf32>
    %51 = vector.extract_strided_slice %42 {offsets = [0, 0], sizes = [8, 8], strides = [1, 1]} : vector<16x8xf32> to vector<8x8xf32>
    %cst_19 = arith.constant dense<0.000000e+00> : vector<8x8xf32>
    %52 = tpu.matmul %50, %51, %cst_19 {dimension_numbers = #tpu.dot_dimension_numbers<[1], [1], [0], [0], [0, 0, 1, 0], [], []>} : vector<8x8xf32>, vector<8x8xf32>, vector<8x8xf32> -> vector<8x8xf32>
    %53 = vector.extract_strided_slice %38 {offsets = [8, 0], sizes = [8, 8], strides = [1, 1]} : vector<16x8xf32> to vector<8x8xf32>
    %54 = vector.extract_strided_slice %42 {offsets = [8, 0], sizes = [8, 8], strides = [1, 1]} : vector<16x8xf32> to vector<8x8xf32>
    %cst_20 = arith.constant dense<0.000000e+00> : vector<8x8xf32>
    %55 = tpu.matmul %53, %54, %cst_20 {dimension_numbers = #tpu.dot_dimension_numbers<[1], [1], [0], [0], [0, 0, 1, 0], [], []>} : vector<8x8xf32>, vector<8x8xf32>, vector<8x8xf32> -> vector<8x8xf32>
    %56 = vector.extract_strided_slice %39 {offsets = [0, 0], sizes = [8, 8], strides = [1, 1]} : vector<16x8xf32> to vector<8x8xf32>
    %57 = vector.extract_strided_slice %43 {offsets = [0, 0], sizes = [8, 8], strides = [1, 1]} : vector<16x8xf32> to vector<8x8xf32>
    %cst_21 = arith.constant dense<0.000000e+00> : vector<8x8xf32>
    %58 = tpu.matmul %56, %57, %cst_21 {dimension_numbers = #tpu.dot_dimension_numbers<[1], [1], [0], [0], [0, 0, 1, 0], [], []>} : vector<8x8xf32>, vector<8x8xf32>, vector<8x8xf32> -> vector<8x8xf32>
    %59 = vector.extract_strided_slice %39 {offsets = [8, 0], sizes = [8, 8], strides = [1, 1]} : vector<16x8xf32> to vector<8x8xf32>
    %60 = vector.extract_strided_slice %43 {offsets = [8, 0], sizes = [8, 8], strides = [1, 1]} : vector<16x8xf32> to vector<8x8xf32>
    %cst_22 = arith.constant dense<0.000000e+00> : vector<8x8xf32>
    %61 = tpu.matmul %59, %60, %cst_22 {dimension_numbers = #tpu.dot_dimension_numbers<[1], [1], [0], [0], [0, 0, 1, 0], [], []>} : vector<8x8xf32>, vector<8x8xf32>, vector<8x8xf32> -> vector<8x8xf32>
    %62 = vector.extract_strided_slice %40 {offsets = [0, 0], sizes = [8, 8], strides = [1, 1]} : vector<16x8xf32> to vector<8x8xf32>
    %63 = vector.extract_strided_slice %44 {offsets = [0, 0], sizes = [8, 8], strides = [1, 1]} : vector<16x8xf32> to vector<8x8xf32>
    %cst_23 = arith.constant dense<0.000000e+00> : vector<8x8xf32>
    %64 = tpu.matmul %62, %63, %cst_23 {dimension_numbers = #tpu.dot_dimension_numbers<[1], [1], [0], [0], [0, 0, 1, 0], [], []>} : vector<8x8xf32>, vector<8x8xf32>, vector<8x8xf32> -> vector<8x8xf32>
    %65 = vector.extract_strided_slice %40 {offsets = [8, 0], sizes = [8, 8], strides = [1, 1]} : vector<16x8xf32> to vector<8x8xf32>
    %66 = vector.extract_strided_slice %44 {offsets = [8, 0], sizes = [8, 8], strides = [1, 1]} : vector<16x8xf32> to vector<8x8xf32>
    %cst_24 = arith.constant dense<0.000000e+00> : vector<8x8xf32>
    %67 = tpu.matmul %65, %66, %cst_24 {dimension_numbers = #tpu.dot_dimension_numbers<[1], [1], [0], [0], [0, 0, 1, 0], [], []>} : vector<8x8xf32>, vector<8x8xf32>, vector<8x8xf32> -> vector<8x8xf32>
    %68 = vector.extract_strided_slice %41 {offsets = [0, 0], sizes = [8, 8], strides = [1, 1]} : vector<16x8xf32> to vector<8x8xf32>
    %69 = vector.extract_strided_slice %45 {offsets = [0, 0], sizes = [8, 8], strides = [1, 1]} : vector<16x8xf32> to vector<8x8xf32>
    %cst_25 = arith.constant dense<0.000000e+00> : vector<8x8xf32>
    %70 = tpu.matmul %68, %69, %cst_25 {dimension_numbers = #tpu.dot_dimension_numbers<[1], [1], [0], [0], [0, 0, 1, 0], [], []>} : vector<8x8xf32>, vector<8x8xf32>, vector<8x8xf32> -> vector<8x8xf32>
    %71 = vector.extract_strided_slice %41 {offsets = [8, 0], sizes = [8, 8], strides = [1, 1]} : vector<16x8xf32> to vector<8x8xf32>
    %72 = vector.extract_strided_slice %45 {offsets = [8, 0], sizes = [8, 8], strides = [1, 1]} : vector<16x8xf32> to vector<8x8xf32>
    %cst_26 = arith.constant dense<0.000000e+00> : vector<8x8xf32>
    %73 = tpu.matmul %71, %72, %cst_26 {dimension_numbers = #tpu.dot_dimension_numbers<[1], [1], [0], [0], [0, 0, 1, 0], [], []>} : vector<8x8xf32>, vector<8x8xf32>, vector<8x8xf32> -> vector<8x8xf32>
    %74 = tpu.concatenate %52, %55, %58, %61, %64, %67, %70, %73 in 0 : vector<8x8xf32>, vector<8x8xf32>, vector<8x8xf32>, vector<8x8xf32>, vector<8x8xf32>, vector<8x8xf32>, vector<8x8xf32>, vector<8x8xf32> -> vector<64x8xf32>
    %cst_27 = arith.constant 0.353553385 : f32
    %75 = vector.broadcast %cst_27 : f32 to vector<64x8xf32>
    %76 = arith.mulf %74, %75 : vector<64x8xf32>
    %cst_28 = arith.constant dense<0xFF800000> : vector<64xf32>
    %77 = vector.multi_reduction <maximumf>, %76, %cst_28 [1] : vector<64x8xf32> to vector<64xf32>
    %78 = vector.shape_cast %77 : vector<64xf32> to vector<64x1xf32>
    %79 = vector.broadcast %78 : vector<64x1xf32> to vector<64x8xf32>
    %80 = arith.subf %76, %79 : vector<64x8xf32>
    %81 = math.exp %80 : vector<64x8xf32>
    %cst_29 = arith.constant dense<0.000000e+00> : vector<64xf32>
    %82 = vector.multi_reduction <add>, %81, %cst_29 [1] : vector<64x8xf32> to vector<64xf32>
    %83 = vector.shape_cast %82 : vector<64xf32> to vector<64x1xf32>
    %84 = tpu.reciprocal %83 {approx = true} : vector<64x1xf32> -> vector<64x1xf32>
    %85 = vector.broadcast %84 : vector<64x1xf32> to vector<64x8xf32>
    %86 = arith.mulf %81, %85 : vector<64x8xf32>
    %87 = vector.extract_strided_slice %86 {offsets = [0, 0], sizes = [8, 8], strides = [1, 1]} : vector<64x8xf32> to vector<8x8xf32>
    %88 = vector.extract_strided_slice %46 {offsets = [0, 0], sizes = [8, 8], strides = [1, 1]} : vector<16x8xf32> to vector<8x8xf32>
    %cst_30 = arith.constant dense<0.000000e+00> : vector<8x8xf32>
    %89 = tpu.matmul %87, %88, %cst_30 {dimension_numbers = #tpu.dot_dimension_numbers<[1], [0], [0], [1], [0, 0, 1, 1], [], []>} : vector<8x8xf32>, vector<8x8xf32>, vector<8x8xf32> -> vector<8x8xf32>
    %c0_31 = arith.constant 0 : index
    %c0_32 = arith.constant 0 : index
    %90 = vector.load %arg3[%c0_31, %c0_32] : memref<16x32xf32, #tpu.memory_space<vmem>>, vector<8x8xf32>
    tpu.vector_store %arg3[%c0_31, %c0_32], %89 {strides = array<i32>} : memref<16x32xf32, #tpu.memory_space<vmem>>, vector<8x8xf32>,
    %91 = vector.extract_strided_slice %86 {offsets = [8, 0], sizes = [8, 8], strides = [1, 1]} : vector<64x8xf32> to vector<8x8xf32>
    %92 = vector.extract_strided_slice %46 {offsets = [8, 0], sizes = [8, 8], strides = [1, 1]} : vector<16x8xf32> to vector<8x8xf32>
    %cst_33 = arith.constant dense<0.000000e+00> : vector<8x8xf32>
    %93 = tpu.matmul %91, %92, %cst_33 {dimension_numbers = #tpu.dot_dimension_numbers<[1], [0], [0], [1], [0, 0, 1, 1], [], []>} : vector<8x8xf32>, vector<8x8xf32>, vector<8x8xf32> -> vector<8x8xf32>
    %c8 = arith.constant 8 : index
    %c0_34 = arith.constant 0 : index
    %94 = vector.load %arg3[%c8, %c0_34] : memref<16x32xf32, #tpu.memory_space<vmem>>, vector<8x8xf32>
    tpu.vector_store %arg3[%c8, %c0_34], %93 {strides = array<i32>} : memref<16x32xf32, #tpu.memory_space<vmem>>, vector<8x8xf32>,
    %95 = vector.extract_strided_slice %86 {offsets = [16, 0], sizes = [8, 8], strides = [1, 1]} : vector<64x8xf32> to vector<8x8xf32>
    %96 = vector.extract_strided_slice %47 {offsets = [0, 0], sizes = [8, 8], strides = [1, 1]} : vector<16x8xf32> to vector<8x8xf32>
    %cst_35 = arith.constant dense<0.000000e+00> : vector<8x8xf32>
    %97 = tpu.matmul %95, %96, %cst_35 {dimension_numbers = #tpu.dot_dimension_numbers<[1], [0], [0], [1], [0, 0, 1, 1], [], []>} : vector<8x8xf32>, vector<8x8xf32>, vector<8x8xf32> -> vector<8x8xf32>
    %c0_36 = arith.constant 0 : index
    %c8_37 = arith.constant 8 : index
    %98 = vector.load %arg3[%c0_36, %c8_37] : memref<16x32xf32, #tpu.memory_space<vmem>>, vector<8x8xf32>
    tpu.vector_store %arg3[%c0_36, %c8_37], %97 {strides = array<i32>} : memref<16x32xf32, #tpu.memory_space<vmem>>, vector<8x8xf32>,
    %99 = vector.extract_strided_slice %86 {offsets = [24, 0], sizes = [8, 8], strides = [1, 1]} : vector<64x8xf32> to vector<8x8xf32>
    %100 = vector.extract_strided_slice %47 {offsets = [8, 0], sizes = [8, 8], strides = [1, 1]} : vector<16x8xf32> to vector<8x8xf32>
    %cst_38 = arith.constant dense<0.000000e+00> : vector<8x8xf32>
    %101 = tpu.matmul %99, %100, %cst_38 {dimension_numbers = #tpu.dot_dimension_numbers<[1], [0], [0], [1], [0, 0, 1, 1], [], []>} : vector<8x8xf32>, vector<8x8xf32>, vector<8x8xf32> -> vector<8x8xf32>
    %c8_39 = arith.constant 8 : index
    %c8_40 = arith.constant 8 : index
    %102 = vector.load %arg3[%c8_39, %c8_40] : memref<16x32xf32, #tpu.memory_space<vmem>>, vector<8x8xf32>
    tpu.vector_store %arg3[%c8_39, %c8_40], %101 {strides = array<i32>} : memref<16x32xf32, #tpu.memory_space<vmem>>, vector<8x8xf32>,
    %103 = vector.extract_strided_slice %86 {offsets = [32, 0], sizes = [8, 8], strides = [1, 1]} : vector<64x8xf32> to vector<8x8xf32>
    %104 = vector.extract_strided_slice %48 {offsets = [0, 0], sizes = [8, 8], strides = [1, 1]} : vector<16x8xf32> to vector<8x8xf32>
    %cst_41 = arith.constant dense<0.000000e+00> : vector<8x8xf32>
    %105 = tpu.matmul %103, %104, %cst_41 {dimension_numbers = #tpu.dot_dimension_numbers<[1], [0], [0], [1], [0, 0, 1, 1], [], []>} : vector<8x8xf32>, vector<8x8xf32>, vector<8x8xf32> -> vector<8x8xf32>
    %c0_42 = arith.constant 0 : index
    %c16 = arith.constant 16 : index
    %106 = vector.load %arg3[%c0_42, %c16] : memref<16x32xf32, #tpu.memory_space<vmem>>, vector<8x8xf32>
    tpu.vector_store %arg3[%c0_42, %c16], %105 {strides = array<i32>} : memref<16x32xf32, #tpu.memory_space<vmem>>, vector<8x8xf32>,
    %107 = vector.extract_strided_slice %86 {offsets = [40, 0], sizes = [8, 8], strides = [1, 1]} : vector<64x8xf32> to vector<8x8xf32>
    %108 = vector.extract_strided_slice %48 {offsets = [8, 0], sizes = [8, 8], strides = [1, 1]} : vector<16x8xf32> to vector<8x8xf32>
    %cst_43 = arith.constant dense<0.000000e+00> : vector<8x8xf32>
    %109 = tpu.matmul %107, %108, %cst_43 {dimension_numbers = #tpu.dot_dimension_numbers<[1], [0], [0], [1], [0, 0, 1, 1], [], []>} : vector<8x8xf32>, vector<8x8xf32>, vector<8x8xf32> -> vector<8x8xf32>
    %c8_44 = arith.constant 8 : index
    %c16_45 = arith.constant 16 : index
    %110 = vector.load %arg3[%c8_44, %c16_45] : memref<16x32xf32, #tpu.memory_space<vmem>>, vector<8x8xf32>
    tpu.vector_store %arg3[%c8_44, %c16_45], %109 {strides = array<i32>} : memref<16x32xf32, #tpu.memory_space<vmem>>, vector<8x8xf32>,
    %111 = vector.extract_strided_slice %86 {offsets = [48, 0], sizes = [8, 8], strides = [1, 1]} : vector<64x8xf32> to vector<8x8xf32>
    %112 = vector.extract_strided_slice %49 {offsets = [0, 0], sizes = [8, 8], strides = [1, 1]} : vector<16x8xf32> to vector<8x8xf32>
    %cst_46 = arith.constant dense<0.000000e+00> : vector<8x8xf32>
    %113 = tpu.matmul %111, %112, %cst_46 {dimension_numbers = #tpu.dot_dimension_numbers<[1], [0], [0], [1], [0, 0, 1, 1], [], []>} : vector<8x8xf32>, vector<8x8xf32>, vector<8x8xf32> -> vector<8x8xf32>
    %c0_47 = arith.constant 0 : index
    %c24 = arith.constant 24 : index
    %114 = vector.load %arg3[%c0_47, %c24] : memref<16x32xf32, #tpu.memory_space<vmem>>, vector<8x8xf32>
    tpu.vector_store %arg3[%c0_47, %c24], %113 {strides = array<i32>} : memref<16x32xf32, #tpu.memory_space<vmem>>, vector<8x8xf32>,
    %115 = vector.extract_strided_slice %86 {offsets = [56, 0], sizes = [8, 8], strides = [1, 1]} : vector<64x8xf32> to vector<8x8xf32>
    %116 = vector.extract_strided_slice %49 {offsets = [8, 0], sizes = [8, 8], strides = [1, 1]} : vector<16x8xf32> to vector<8x8xf32>
    %cst_48 = arith.constant dense<0.000000e+00> : vector<8x8xf32>
    %117 = tpu.matmul %115, %116, %cst_48 {dimension_numbers = #tpu.dot_dimension_numbers<[1], [0], [0], [1], [0, 0, 1, 1], [], []>} : vector<8x8xf32>, vector<8x8xf32>, vector<8x8xf32> -> vector<8x8xf32>
    %c8_49 = arith.constant 8 : index
    %c24_50 = arith.constant 24 : index
    %118 = vector.load %arg3[%c8_49, %c24_50] : memref<16x32xf32, #tpu.memory_space<vmem>>, vector<8x8xf32>
    tpu.vector_store %arg3[%c8_49, %c24_50], %117 {strides = array<i32>} : memref<16x32xf32, #tpu.memory_space<vmem>>, vector<8x8xf32>,
    %c0_51 = arith.constant 0 : index
    %c0_52 = arith.constant 0 : index
    %119 = vector.load %arg3[%c0_51, %c0_52] : memref<16x32xf32, #tpu.memory_space<vmem>>, vector<16x32xf32>
    %cst_53 = arith.constant dense<0.000000e+00> : vector<16x32xf32>
    %120 = tpu.matmul %119, %2, %cst_53 {dimension_numbers = #tpu.dot_dimension_numbers<[1], [0], [0], [1], [0, 0, 1, 1], [], []>} : vector<16x32xf32>, vector<32x32xf32>, vector<16x32xf32> -> vector<16x32xf32>
    %121 = vector.broadcast %8 : vector<1x32xf32> to vector<16x32xf32>
    %122 = arith.addf %120, %121 : vector<16x32xf32>
    %123 = arith.addf %0, %122 : vector<16x32xf32>
    %cst_54 = arith.constant dense<0.000000e+00> : vector<16xf32>
    %124 = vector.multi_reduction <add>, %123, %cst_54 [1] : vector<16x32xf32> to vector<16xf32>
    %125 = vector.shape_cast %124 : vector<16xf32> to vector<16x1xf32>
    %cst_55 = arith.constant 3.200000e+01 : f32
    %126 = vector.broadcast %cst_55 : f32 to vector<16x1xf32>
    %127 = arith.divf %125, %126 : vector<16x1xf32>
    %128 = vector.broadcast %127 : vector<16x1xf32> to vector<16x32xf32>
    %129 = arith.subf %123, %128 : vector<16x32xf32>
    %130 = arith.mulf %129, %129 : vector<16x32xf32>
    %cst_56 = arith.constant dense<0.000000e+00> : vector<16xf32>
    %131 = vector.multi_reduction <add>, %130, %cst_56 [1] : vector<16x32xf32> to vector<16xf32>
    %132 = vector.shape_cast %131 : vector<16xf32> to vector<16x1xf32>
    %cst_57 = arith.constant 0.0322580636 : f32
    %133 = vector.broadcast %cst_57 : f32 to vector<16x1xf32>
    %134 = arith.mulf %132, %133 : vector<16x1xf32>
    %135 = vector.broadcast %127 : vector<16x1xf32> to vector<16x32xf32>
    %136 = arith.subf %123, %135 : vector<16x32xf32>
    %137 = vector.broadcast %9 : vector<1x32xf32> to vector<16x32xf32>
    %138 = arith.mulf %137, %136 : vector<16x32xf32>
    %139 = math.sqrt %134 : vector<16x1xf32>
    %cst_58 = arith.constant 9.99999997E-7 : f32
    %140 = vector.broadcast %cst_58 : f32 to vector<16x1xf32>
    %141 = arith.addf %139, %140 : vector<16x1xf32>
    %142 = vector.broadcast %141 : vector<16x1xf32> to vector<16x32xf32>
    %143 = arith.divf %138, %142 : vector<16x32xf32>
    %144 = vector.broadcast %10 : vector<1x32xf32> to vector<16x32xf32>
    %145 = arith.addf %143, %144 : vector<16x32xf32>
    %cst_59 = arith.constant dense<0.000000e+00> : vector<16x64xf32>
    %146 = tpu.matmul %145, %3, %cst_59 {dimension_numbers = #tpu.dot_dimension_numbers<[1], [0], [0], [1], [0, 0, 1, 1], [], []>} : vector<16x32xf32>, vector<32x64xf32>, vector<16x64xf32> -> vector<16x64xf32>
    %147 = vector.broadcast %11 : vector<1x64xf32> to vector<16x64xf32>
    %148 = arith.addf %146, %147 : vector<16x64xf32>
    %cst_60 = arith.constant 0.000000e+00 : f32
    %149 = vector.broadcast %cst_60 : f32 to vector<16x64xf32>
    %150 = arith.maximumf %148, %149 : vector<16x64xf32>
    %cst_61 = arith.constant dense<0.000000e+00> : vector<16x32xf32>
    %151 = tpu.matmul %150, %4, %cst_61 {dimension_numbers = #tpu.dot_dimension_numbers<[1], [0], [0], [1], [0, 0, 1, 1], [], []>} : vector<16x64xf32>, vector<64x32xf32>, vector<16x32xf32> -> vector<16x32xf32>
    %152 = vector.broadcast %12 : vector<1x32xf32> to vector<16x32xf32>
    %153 = arith.addf %151, %152 : vector<16x32xf32>
    %154 = arith.addf %123, %153 : vector<16x32xf32>
    %c168 = arith.constant 168 : index
    %c0_62 = arith.constant 0 : index
    %155 = vector.load %arg1[%c168, %c0_62] : memref<376x128xf32, #tpu.memory_space<vmem>>, vector<32x96xf32>
    %c200 = arith.constant 200 : index
    %c0_63 = arith.constant 0 : index
    %156 = vector.load %arg1[%c200, %c0_63] : memref<376x128xf32, #tpu.memory_space<vmem>>, vector<32x32xf32>
    %c232 = arith.constant 232 : index
    %c0_64 = arith.constant 0 : index
    %157 = vector.load %arg1[%c232, %c0_64] : memref<376x128xf32, #tpu.memory_space<vmem>>, vector<32x64xf32>
    %c264 = arith.constant 264 : index
    %c0_65 = arith.constant 0 : index
    %158 = vector.load %arg1[%c264, %c0_65] : memref<376x128xf32, #tpu.memory_space<vmem>>, vector<64x32xf32>
    %c328 = arith.constant 328 : index
    %c0_66 = arith.constant 0 : index
    %159 = vector.load %arg1[%c328, %c0_66] : memref<376x128xf32, #tpu.memory_space<vmem>>, vector<1x32xf32>
    %c329 = arith.constant 329 : index
    %c0_67 = arith.constant 0 : index
    %160 = vector.load %arg1[%c329, %c0_67] : memref<376x128xf32, #tpu.memory_space<vmem>>, vector<1x32xf32>
    %c330 = arith.constant 330 : index
    %c0_68 = arith.constant 0 : index
    %161 = vector.load %arg1[%c330, %c0_68] : memref<376x128xf32, #tpu.memory_space<vmem>>, vector<1x96xf32>
    %c331 = arith.constant 331 : index
    %c0_69 = arith.constant 0 : index
    %162 = vector.load %arg1[%c331, %c0_69] : memref<376x128xf32, #tpu.memory_space<vmem>>, vector<1x32xf32>
    %c332 = arith.constant 332 : index
    %c0_70 = arith.constant 0 : index
    %163 = vector.load %arg1[%c332, %c0_70] : memref<376x128xf32, #tpu.memory_space<vmem>>, vector<1x32xf32>
    %c333 = arith.constant 333 : index
    %c0_71 = arith.constant 0 : index
    %164 = vector.load %arg1[%c333, %c0_71] : memref<376x128xf32, #tpu.memory_space<vmem>>, vector<1x32xf32>
    %c334 = arith.constant 334 : index
    %c0_72 = arith.constant 0 : index
    %165 = vector.load %arg1[%c334, %c0_72] : memref<376x128xf32, #tpu.memory_space<vmem>>, vector<1x64xf32>
    %c335 = arith.constant 335 : index
    %c0_73 = arith.constant 0 : index
    %166 = vector.load %arg1[%c335, %c0_73] : memref<376x128xf32, #tpu.memory_space<vmem>>, vector<1x32xf32>
    %cst_74 = arith.constant dense<0.000000e+00> : vector<16xf32>
    %167 = vector.multi_reduction <add>, %154, %cst_74 [1] : vector<16x32xf32> to vector<16xf32>
    %168 = vector.shape_cast %167 : vector<16xf32> to vector<16x1xf32>
    %cst_75 = arith.constant 3.200000e+01 : f32
    %169 = vector.broadcast %cst_75 : f32 to vector<16x1xf32>
    %170 = arith.divf %168, %169 : vector<16x1xf32>
    %171 = vector.broadcast %170 : vector<16x1xf32> to vector<16x32xf32>
    %172 = arith.subf %154, %171 : vector<16x32xf32>
    %173 = arith.mulf %172, %172 : vector<16x32xf32>
    %cst_76 = arith.constant dense<0.000000e+00> : vector<16xf32>
    %174 = vector.multi_reduction <add>, %173, %cst_76 [1] : vector<16x32xf32> to vector<16xf32>
    %175 = vector.shape_cast %174 : vector<16xf32> to vector<16x1xf32>
    %cst_77 = arith.constant 0.0322580636 : f32
    %176 = vector.broadcast %cst_77 : f32 to vector<16x1xf32>
    %177 = arith.mulf %175, %176 : vector<16x1xf32>
    %178 = vector.broadcast %170 : vector<16x1xf32> to vector<16x32xf32>
    %179 = arith.subf %154, %178 : vector<16x32xf32>
    %180 = vector.broadcast %159 : vector<1x32xf32> to vector<16x32xf32>
    %181 = arith.mulf %180, %179 : vector<16x32xf32>
    %182 = math.sqrt %177 : vector<16x1xf32>
    %cst_78 = arith.constant 9.99999997E-7 : f32
    %183 = vector.broadcast %cst_78 : f32 to vector<16x1xf32>
    %184 = arith.addf %182, %183 : vector<16x1xf32>
    %185 = vector.broadcast %184 : vector<16x1xf32> to vector<16x32xf32>
    %186 = arith.divf %181, %185 : vector<16x32xf32>
    %187 = vector.broadcast %160 : vector<1x32xf32> to vector<16x32xf32>
    %188 = arith.addf %186, %187 : vector<16x32xf32>
    %cst_79 = arith.constant dense<0.000000e+00> : vector<16x96xf32>
    %189 = tpu.matmul %188, %155, %cst_79 {dimension_numbers = #tpu.dot_dimension_numbers<[1], [0], [0], [1], [0, 0, 1, 1], [], []>} : vector<16x32xf32>, vector<32x96xf32>, vector<16x96xf32> -> vector<16x96xf32>
    %190 = vector.broadcast %161 : vector<1x96xf32> to vector<16x96xf32>
    %191 = arith.addf %189, %190 : vector<16x96xf32>
    %192 = vector.extract_strided_slice %191 {offsets = [0, 0], sizes = [16, 8], strides = [1, 1]} : vector<16x96xf32> to vector<16x8xf32>
    %193 = vector.extract_strided_slice %191 {offsets = [0, 8], sizes = [16, 8], strides = [1, 1]} : vector<16x96xf32> to vector<16x8xf32>
    %194 = vector.extract_strided_slice %191 {offsets = [0, 16], sizes = [16, 8], strides = [1, 1]} : vector<16x96xf32> to vector<16x8xf32>
    %195 = vector.extract_strided_slice %191 {offsets = [0, 24], sizes = [16, 8], strides = [1, 1]} : vector<16x96xf32> to vector<16x8xf32>
    %196 = vector.extract_strided_slice %191 {offsets = [0, 32], sizes = [16, 8], strides = [1, 1]} : vector<16x96xf32> to vector<16x8xf32>
    %197 = vector.extract_strided_slice %191 {offsets = [0, 40], sizes = [16, 8], strides = [1, 1]} : vector<16x96xf32> to vector<16x8xf32>
    %198 = vector.extract_strided_slice %191 {offsets = [0, 48], sizes = [16, 8], strides = [1, 1]} : vector<16x96xf32> to vector<16x8xf32>
    %199 = vector.extract_strided_slice %191 {offsets = [0, 56], sizes = [16, 8], strides = [1, 1]} : vector<16x96xf32> to vector<16x8xf32>
    %200 = vector.extract_strided_slice %191 {offsets = [0, 64], sizes = [16, 8], strides = [1, 1]} : vector<16x96xf32> to vector<16x8xf32>
    %201 = vector.extract_strided_slice %191 {offsets = [0, 72], sizes = [16, 8], strides = [1, 1]} : vector<16x96xf32> to vector<16x8xf32>
    %202 = vector.extract_strided_slice %191 {offsets = [0, 80], sizes = [16, 8], strides = [1, 1]} : vector<16x96xf32> to vector<16x8xf32>
    %203 = vector.extract_strided_slice %191 {offsets = [0, 88], sizes = [16, 8], strides = [1, 1]} : vector<16x96xf32> to vector<16x8xf32>
    %204 = vector.extract_strided_slice %192 {offsets = [0, 0], sizes = [8, 8], strides = [1, 1]} : vector<16x8xf32> to vector<8x8xf32>
    %205 = vector.extract_strided_slice %196 {offsets = [0, 0], sizes = [8, 8], strides = [1, 1]} : vector<16x8xf32> to vector<8x8xf32>
    %cst_80 = arith.constant dense<0.000000e+00> : vector<8x8xf32>
    %206 = tpu.matmul %204, %205, %cst_80 {dimension_numbers = #tpu.dot_dimension_numbers<[1], [1], [0], [0], [0, 0, 1, 0], [], []>} : vector<8x8xf32>, vector<8x8xf32>, vector<8x8xf32> -> vector<8x8xf32>
    %207 = vector.extract_strided_slice %192 {offsets = [8, 0], sizes = [8, 8], strides = [1, 1]} : vector<16x8xf32> to vector<8x8xf32>
    %208 = vector.extract_strided_slice %196 {offsets = [8, 0], sizes = [8, 8], strides = [1, 1]} : vector<16x8xf32> to vector<8x8xf32>
    %cst_81 = arith.constant dense<0.000000e+00> : vector<8x8xf32>
    %209 = tpu.matmul %207, %208, %cst_81 {dimension_numbers = #tpu.dot_dimension_numbers<[1], [1], [0], [0], [0, 0, 1, 0], [], []>} : vector<8x8xf32>, vector<8x8xf32>, vector<8x8xf32> -> vector<8x8xf32>
    %210 = vector.extract_strided_slice %193 {offsets = [0, 0], sizes = [8, 8], strides = [1, 1]} : vector<16x8xf32> to vector<8x8xf32>
    %211 = vector.extract_strided_slice %197 {offsets = [0, 0], sizes = [8, 8], strides = [1, 1]} : vector<16x8xf32> to vector<8x8xf32>
    %cst_82 = arith.constant dense<0.000000e+00> : vector<8x8xf32>
    %212 = tpu.matmul %210, %211, %cst_82 {dimension_numbers = #tpu.dot_dimension_numbers<[1], [1], [0], [0], [0, 0, 1, 0], [], []>} : vector<8x8xf32>, vector<8x8xf32>, vector<8x8xf32> -> vector<8x8xf32>
    %213 = vector.extract_strided_slice %193 {offsets = [8, 0], sizes = [8, 8], strides = [1, 1]} : vector<16x8xf32> to vector<8x8xf32>
    %214 = vector.extract_strided_slice %197 {offsets = [8, 0], sizes = [8, 8], strides = [1, 1]} : vector<16x8xf32> to vector<8x8xf32>
    %cst_83 = arith.constant dense<0.000000e+00> : vector<8x8xf32>
    %215 = tpu.matmul %213, %214, %cst_83 {dimension_numbers = #tpu.dot_dimension_numbers<[1], [1], [0], [0], [0, 0, 1, 0], [], []>} : vector<8x8xf32>, vector<8x8xf32>, vector<8x8xf32> -> vector<8x8xf32>
    %216 = vector.extract_strided_slice %194 {offsets = [0, 0], sizes = [8, 8], strides = [1, 1]} : vector<16x8xf32> to vector<8x8xf32>
    %217 = vector.extract_strided_slice %198 {offsets = [0, 0], sizes = [8, 8], strides = [1, 1]} : vector<16x8xf32> to vector<8x8xf32>
    %cst_84 = arith.constant dense<0.000000e+00> : vector<8x8xf32>
    %218 = tpu.matmul %216, %217, %cst_84 {dimension_numbers = #tpu.dot_dimension_numbers<[1], [1], [0], [0], [0, 0, 1, 0], [], []>} : vector<8x8xf32>, vector<8x8xf32>, vector<8x8xf32> -> vector<8x8xf32>
    %219 = vector.extract_strided_slice %194 {offsets = [8, 0], sizes = [8, 8], strides = [1, 1]} : vector<16x8xf32> to vector<8x8xf32>
    %220 = vector.extract_strided_slice %198 {offsets = [8, 0], sizes = [8, 8], strides = [1, 1]} : vector<16x8xf32> to vector<8x8xf32>
    %cst_85 = arith.constant dense<0.000000e+00> : vector<8x8xf32>
    %221 = tpu.matmul %219, %220, %cst_85 {dimension_numbers = #tpu.dot_dimension_numbers<[1], [1], [0], [0], [0, 0, 1, 0], [], []>} : vector<8x8xf32>, vector<8x8xf32>, vector<8x8xf32> -> vector<8x8xf32>
    %222 = vector.extract_strided_slice %195 {offsets = [0, 0], sizes = [8, 8], strides = [1, 1]} : vector<16x8xf32> to vector<8x8xf32>
    %223 = vector.extract_strided_slice %199 {offsets = [0, 0], sizes = [8, 8], strides = [1, 1]} : vector<16x8xf32> to vector<8x8xf32>
    %cst_86 = arith.constant dense<0.000000e+00> : vector<8x8xf32>
    %224 = tpu.matmul %222, %223, %cst_86 {dimension_numbers = #tpu.dot_dimension_numbers<[1], [1], [0], [0], [0, 0, 1, 0], [], []>} : vector<8x8xf32>, vector<8x8xf32>, vector<8x8xf32> -> vector<8x8xf32>
    %225 = vector.extract_strided_slice %195 {offsets = [8, 0], sizes = [8, 8], strides = [1, 1]} : vector<16x8xf32> to vector<8x8xf32>
    %226 = vector.extract_strided_slice %199 {offsets = [8, 0], sizes = [8, 8], strides = [1, 1]} : vector<16x8xf32> to vector<8x8xf32>
    %cst_87 = arith.constant dense<0.000000e+00> : vector<8x8xf32>
    %227 = tpu.matmul %225, %226, %cst_87 {dimension_numbers = #tpu.dot_dimension_numbers<[1], [1], [0], [0], [0, 0, 1, 0], [], []>} : vector<8x8xf32>, vector<8x8xf32>, vector<8x8xf32> -> vector<8x8xf32>
    %228 = tpu.concatenate %206, %209, %212, %215, %218, %221, %224, %227 in 0 : vector<8x8xf32>, vector<8x8xf32>, vector<8x8xf32>, vector<8x8xf32>, vector<8x8xf32>, vector<8x8xf32>, vector<8x8xf32>, vector<8x8xf32> -> vector<64x8xf32>
    %cst_88 = arith.constant 0.353553385 : f32
    %229 = vector.broadcast %cst_88 : f32 to vector<64x8xf32>
    %230 = arith.mulf %228, %229 : vector<64x8xf32>
    %cst_89 = arith.constant dense<0xFF800000> : vector<64xf32>
    %231 = vector.multi_reduction <maximumf>, %230, %cst_89 [1] : vector<64x8xf32> to vector<64xf32>
    %232 = vector.shape_cast %231 : vector<64xf32> to vector<64x1xf32>
    %233 = vector.broadcast %232 : vector<64x1xf32> to vector<64x8xf32>
    %234 = arith.subf %230, %233 : vector<64x8xf32>
    %235 = math.exp %234 : vector<64x8xf32>
    %cst_90 = arith.constant dense<0.000000e+00> : vector<64xf32>
    %236 = vector.multi_reduction <add>, %235, %cst_90 [1] : vector<64x8xf32> to vector<64xf32>
    %237 = vector.shape_cast %236 : vector<64xf32> to vector<64x1xf32>
    %238 = tpu.reciprocal %237 {approx = true} : vector<64x1xf32> -> vector<64x1xf32>
    %239 = vector.broadcast %238 : vector<64x1xf32> to vector<64x8xf32>
    %240 = arith.mulf %235, %239 : vector<64x8xf32>
    %241 = vector.extract_strided_slice %240 {offsets = [0, 0], sizes = [8, 8], strides = [1, 1]} : vector<64x8xf32> to vector<8x8xf32>
    %242 = vector.extract_strided_slice %200 {offsets = [0, 0], sizes = [8, 8], strides = [1, 1]} : vector<16x8xf32> to vector<8x8xf32>
    %cst_91 = arith.constant dense<0.000000e+00> : vector<8x8xf32>
    %243 = tpu.matmul %241, %242, %cst_91 {dimension_numbers = #tpu.dot_dimension_numbers<[1], [0], [0], [1], [0, 0, 1, 1], [], []>} : vector<8x8xf32>, vector<8x8xf32>, vector<8x8xf32> -> vector<8x8xf32>
    %c0_92 = arith.constant 0 : index
    %c0_93 = arith.constant 0 : index
    %244 = vector.load %arg3[%c0_92, %c0_93] : memref<16x32xf32, #tpu.memory_space<vmem>>, vector<8x8xf32>
    tpu.vector_store %arg3[%c0_92, %c0_93], %243 {strides = array<i32>} : memref<16x32xf32, #tpu.memory_space<vmem>>, vector<8x8xf32>,
    %245 = vector.extract_strided_slice %240 {offsets = [8, 0], sizes = [8, 8], strides = [1, 1]} : vector<64x8xf32> to vector<8x8xf32>
    %246 = vector.extract_strided_slice %200 {offsets = [8, 0], sizes = [8, 8], strides = [1, 1]} : vector<16x8xf32> to vector<8x8xf32>
    %cst_94 = arith.constant dense<0.000000e+00> : vector<8x8xf32>
    %247 = tpu.matmul %245, %246, %cst_94 {dimension_numbers = #tpu.dot_dimension_numbers<[1], [0], [0], [1], [0, 0, 1, 1], [], []>} : vector<8x8xf32>, vector<8x8xf32>, vector<8x8xf32> -> vector<8x8xf32>
    %c8_95 = arith.constant 8 : index
    %c0_96 = arith.constant 0 : index
    %248 = vector.load %arg3[%c8_95, %c0_96] : memref<16x32xf32, #tpu.memory_space<vmem>>, vector<8x8xf32>
    tpu.vector_store %arg3[%c8_95, %c0_96], %247 {strides = array<i32>} : memref<16x32xf32, #tpu.memory_space<vmem>>, vector<8x8xf32>,
    %249 = vector.extract_strided_slice %240 {offsets = [16, 0], sizes = [8, 8], strides = [1, 1]} : vector<64x8xf32> to vector<8x8xf32>
    %250 = vector.extract_strided_slice %201 {offsets = [0, 0], sizes = [8, 8], strides = [1, 1]} : vector<16x8xf32> to vector<8x8xf32>
    %cst_97 = arith.constant dense<0.000000e+00> : vector<8x8xf32>
    %251 = tpu.matmul %249, %250, %cst_97 {dimension_numbers = #tpu.dot_dimension_numbers<[1], [0], [0], [1], [0, 0, 1, 1], [], []>} : vector<8x8xf32>, vector<8x8xf32>, vector<8x8xf32> -> vector<8x8xf32>
    %c0_98 = arith.constant 0 : index
    %c8_99 = arith.constant 8 : index
    %252 = vector.load %arg3[%c0_98, %c8_99] : memref<16x32xf32, #tpu.memory_space<vmem>>, vector<8x8xf32>
    tpu.vector_store %arg3[%c0_98, %c8_99], %251 {strides = array<i32>} : memref<16x32xf32, #tpu.memory_space<vmem>>, vector<8x8xf32>,
    %253 = vector.extract_strided_slice %240 {offsets = [24, 0], sizes = [8, 8], strides = [1, 1]} : vector<64x8xf32> to vector<8x8xf32>
    %254 = vector.extract_strided_slice %201 {offsets = [8, 0], sizes = [8, 8], strides = [1, 1]} : vector<16x8xf32> to vector<8x8xf32>
    %cst_100 = arith.constant dense<0.000000e+00> : vector<8x8xf32>
    %255 = tpu.matmul %253, %254, %cst_100 {dimension_numbers = #tpu.dot_dimension_numbers<[1], [0], [0], [1], [0, 0, 1, 1], [], []>} : vector<8x8xf32>, vector<8x8xf32>, vector<8x8xf32> -> vector<8x8xf32>
    %c8_101 = arith.constant 8 : index
    %c8_102 = arith.constant 8 : index
    %256 = vector.load %arg3[%c8_101, %c8_102] : memref<16x32xf32, #tpu.memory_space<vmem>>, vector<8x8xf32>
    tpu.vector_store %arg3[%c8_101, %c8_102], %255 {strides = array<i32>} : memref<16x32xf32, #tpu.memory_space<vmem>>, vector<8x8xf32>,
    %257 = vector.extract_strided_slice %240 {offsets = [32, 0], sizes = [8, 8], strides = [1, 1]} : vector<64x8xf32> to vector<8x8xf32>
    %258 = vector.extract_strided_slice %202 {offsets = [0, 0], sizes = [8, 8], strides = [1, 1]} : vector<16x8xf32> to vector<8x8xf32>
    %cst_103 = arith.constant dense<0.000000e+00> : vector<8x8xf32>
    %259 = tpu.matmul %257, %258, %cst_103 {dimension_numbers = #tpu.dot_dimension_numbers<[1], [0], [0], [1], [0, 0, 1, 1], [], []>} : vector<8x8xf32>, vector<8x8xf32>, vector<8x8xf32> -> vector<8x8xf32>
    %c0_104 = arith.constant 0 : index
    %c16_105 = arith.constant 16 : index
    %260 = vector.load %arg3[%c0_104, %c16_105] : memref<16x32xf32, #tpu.memory_space<vmem>>, vector<8x8xf32>
    tpu.vector_store %arg3[%c0_104, %c16_105], %259 {strides = array<i32>} : memref<16x32xf32, #tpu.memory_space<vmem>>, vector<8x8xf32>,
    %261 = vector.extract_strided_slice %240 {offsets = [40, 0], sizes = [8, 8], strides = [1, 1]} : vector<64x8xf32> to vector<8x8xf32>
    %262 = vector.extract_strided_slice %202 {offsets = [8, 0], sizes = [8, 8], strides = [1, 1]} : vector<16x8xf32> to vector<8x8xf32>
    %cst_106 = arith.constant dense<0.000000e+00> : vector<8x8xf32>
    %263 = tpu.matmul %261, %262, %cst_106 {dimension_numbers = #tpu.dot_dimension_numbers<[1], [0], [0], [1], [0, 0, 1, 1], [], []>} : vector<8x8xf32>, vector<8x8xf32>, vector<8x8xf32> -> vector<8x8xf32>
    %c8_107 = arith.constant 8 : index
    %c16_108 = arith.constant 16 : index
    %264 = vector.load %arg3[%c8_107, %c16_108] : memref<16x32xf32, #tpu.memory_space<vmem>>, vector<8x8xf32>
    tpu.vector_store %arg3[%c8_107, %c16_108], %263 {strides = array<i32>} : memref<16x32xf32, #tpu.memory_space<vmem>>, vector<8x8xf32>,
    %265 = vector.extract_strided_slice %240 {offsets = [48, 0], sizes = [8, 8], strides = [1, 1]} : vector<64x8xf32> to vector<8x8xf32>
    %266 = vector.extract_strided_slice %203 {offsets = [0, 0], sizes = [8, 8], strides = [1, 1]} : vector<16x8xf32> to vector<8x8xf32>
    %cst_109 = arith.constant dense<0.000000e+00> : vector<8x8xf32>
    %267 = tpu.matmul %265, %266, %cst_109 {dimension_numbers = #tpu.dot_dimension_numbers<[1], [0], [0], [1], [0, 0, 1, 1], [], []>} : vector<8x8xf32>, vector<8x8xf32>, vector<8x8xf32> -> vector<8x8xf32>
    %c0_110 = arith.constant 0 : index
    %c24_111 = arith.constant 24 : index
    %268 = vector.load %arg3[%c0_110, %c24_111] : memref<16x32xf32, #tpu.memory_space<vmem>>, vector<8x8xf32>
    tpu.vector_store %arg3[%c0_110, %c24_111], %267 {strides = array<i32>} : memref<16x32xf32, #tpu.memory_space<vmem>>, vector<8x8xf32>,
    %269 = vector.extract_strided_slice %240 {offsets = [56, 0], sizes = [8, 8], strides = [1, 1]} : vector<64x8xf32> to vector<8x8xf32>
    %270 = vector.extract_strided_slice %203 {offsets = [8, 0], sizes = [8, 8], strides = [1, 1]} : vector<16x8xf32> to vector<8x8xf32>
    %cst_112 = arith.constant dense<0.000000e+00> : vector<8x8xf32>
    %271 = tpu.matmul %269, %270, %cst_112 {dimension_numbers = #tpu.dot_dimension_numbers<[1], [0], [0], [1], [0, 0, 1, 1], [], []>} : vector<8x8xf32>, vector<8x8xf32>, vector<8x8xf32> -> vector<8x8xf32>
    %c8_113 = arith.constant 8 : index
    %c24_114 = arith.constant 24 : index
    %272 = vector.load %arg3[%c8_113, %c24_114] : memref<16x32xf32, #tpu.memory_space<vmem>>, vector<8x8xf32>
    tpu.vector_store %arg3[%c8_113, %c24_114], %271 {strides = array<i32>} : memref<16x32xf32, #tpu.memory_space<vmem>>, vector<8x8xf32>,
    %c0_115 = arith.constant 0 : index
    %c0_116 = arith.constant 0 : index
    %273 = vector.load %arg3[%c0_115, %c0_116] : memref<16x32xf32, #tpu.memory_space<vmem>>, vector<16x32xf32>
    %cst_117 = arith.constant dense<0.000000e+00> : vector<16x32xf32>
    %274 = tpu.matmul %273, %156, %cst_117 {dimension_numbers = #tpu.dot_dimension_numbers<[1], [0], [0], [1], [0, 0, 1, 1], [], []>} : vector<16x32xf32>, vector<32x32xf32>, vector<16x32xf32> -> vector<16x32xf32>
    %275 = vector.broadcast %162 : vector<1x32xf32> to vector<16x32xf32>
    %276 = arith.addf %274, %275 : vector<16x32xf32>
    %277 = arith.addf %154, %276 : vector<16x32xf32>
    %cst_118 = arith.constant dense<0.000000e+00> : vector<16xf32>
    %278 = vector.multi_reduction <add>, %277, %cst_118 [1] : vector<16x32xf32> to vector<16xf32>
    %279 = vector.shape_cast %278 : vector<16xf32> to vector<16x1xf32>
    %cst_119 = arith.constant 3.200000e+01 : f32
    %280 = vector.broadcast %cst_119 : f32 to vector<16x1xf32>
    %281 = arith.divf %279, %280 : vector<16x1xf32>
    %282 = vector.broadcast %281 : vector<16x1xf32> to vector<16x32xf32>
    %283 = arith.subf %277, %282 : vector<16x32xf32>
    %284 = arith.mulf %283, %283 : vector<16x32xf32>
    %cst_120 = arith.constant dense<0.000000e+00> : vector<16xf32>
    %285 = vector.multi_reduction <add>, %284, %cst_120 [1] : vector<16x32xf32> to vector<16xf32>
    %286 = vector.shape_cast %285 : vector<16xf32> to vector<16x1xf32>
    %cst_121 = arith.constant 0.0322580636 : f32
    %287 = vector.broadcast %cst_121 : f32 to vector<16x1xf32>
    %288 = arith.mulf %286, %287 : vector<16x1xf32>
    %289 = vector.broadcast %281 : vector<16x1xf32> to vector<16x32xf32>
    %290 = arith.subf %277, %289 : vector<16x32xf32>
    %291 = vector.broadcast %163 : vector<1x32xf32> to vector<16x32xf32>
    %292 = arith.mulf %291, %290 : vector<16x32xf32>
    %293 = math.sqrt %288 : vector<16x1xf32>
    %cst_122 = arith.constant 9.99999997E-7 : f32
    %294 = vector.broadcast %cst_122 : f32 to vector<16x1xf32>
    %295 = arith.addf %293, %294 : vector<16x1xf32>
    %296 = vector.broadcast %295 : vector<16x1xf32> to vector<16x32xf32>
    %297 = arith.divf %292, %296 : vector<16x32xf32>
    %298 = vector.broadcast %164 : vector<1x32xf32> to vector<16x32xf32>
    %299 = arith.addf %297, %298 : vector<16x32xf32>
    %cst_123 = arith.constant dense<0.000000e+00> : vector<16x64xf32>
    %300 = tpu.matmul %299, %157, %cst_123 {dimension_numbers = #tpu.dot_dimension_numbers<[1], [0], [0], [1], [0, 0, 1, 1], [], []>} : vector<16x32xf32>, vector<32x64xf32>, vector<16x64xf32> -> vector<16x64xf32>
    %301 = vector.broadcast %165 : vector<1x64xf32> to vector<16x64xf32>
    %302 = arith.addf %300, %301 : vector<16x64xf32>
    %cst_124 = arith.constant 0.000000e+00 : f32
    %303 = vector.broadcast %cst_124 : f32 to vector<16x64xf32>
    %304 = arith.maximumf %302, %303 : vector<16x64xf32>
    %cst_125 = arith.constant dense<0.000000e+00> : vector<16x32xf32>
    %305 = tpu.matmul %304, %158, %cst_125 {dimension_numbers = #tpu.dot_dimension_numbers<[1], [0], [0], [1], [0, 0, 1, 1], [], []>} : vector<16x64xf32>, vector<64x32xf32>, vector<16x32xf32> -> vector<16x32xf32>
    %306 = vector.broadcast %166 : vector<1x32xf32> to vector<16x32xf32>
    %307 = arith.addf %305, %306 : vector<16x32xf32>
    %308 = arith.addf %277, %307 : vector<16x32xf32>
    %c368 = arith.constant 368 : index
    %c0_126 = arith.constant 0 : index
    %309 = vector.load %arg1[%c368, %c0_126] : memref<376x128xf32, #tpu.memory_space<vmem>>, vector<1x32xf32>
    %c369 = arith.constant 369 : index
    %c0_127 = arith.constant 0 : index
    %310 = vector.load %arg1[%c369, %c0_127] : memref<376x128xf32, #tpu.memory_space<vmem>>, vector<1x32xf32>
    %c336 = arith.constant 336 : index
    %c0_128 = arith.constant 0 : index
    %311 = vector.load %arg1[%c336, %c0_128] : memref<376x128xf32, #tpu.memory_space<vmem>>, vector<32x16xf32>
    %c370 = arith.constant 370 : index
    %c0_129 = arith.constant 0 : index
    %312 = vector.load %arg1[%c370, %c0_129] : memref<376x128xf32, #tpu.memory_space<vmem>>, vector<1x16xf32>
    %cst_130 = arith.constant dense<0.000000e+00> : vector<16xf32>
    %313 = vector.multi_reduction <add>, %308, %cst_130 [1] : vector<16x32xf32> to vector<16xf32>
    %314 = vector.shape_cast %313 : vector<16xf32> to vector<16x1xf32>
    %cst_131 = arith.constant 3.200000e+01 : f32
    %315 = vector.broadcast %cst_131 : f32 to vector<16x1xf32>
    %316 = arith.divf %314, %315 : vector<16x1xf32>
    %317 = vector.broadcast %316 : vector<16x1xf32> to vector<16x32xf32>
    %318 = arith.subf %308, %317 : vector<16x32xf32>
    %319 = arith.mulf %318, %318 : vector<16x32xf32>
    %cst_132 = arith.constant dense<0.000000e+00> : vector<16xf32>
    %320 = vector.multi_reduction <add>, %319, %cst_132 [1] : vector<16x32xf32> to vector<16xf32>
    %321 = vector.shape_cast %320 : vector<16xf32> to vector<16x1xf32>
    %cst_133 = arith.constant 0.0322580636 : f32
    %322 = vector.broadcast %cst_133 : f32 to vector<16x1xf32>
    %323 = arith.mulf %321, %322 : vector<16x1xf32>
    %324 = vector.broadcast %316 : vector<16x1xf32> to vector<16x32xf32>
    %325 = arith.subf %308, %324 : vector<16x32xf32>
    %326 = vector.broadcast %309 : vector<1x32xf32> to vector<16x32xf32>
    %327 = arith.mulf %326, %325 : vector<16x32xf32>
    %328 = math.sqrt %323 : vector<16x1xf32>
    %cst_134 = arith.constant 9.99999997E-7 : f32
    %329 = vector.broadcast %cst_134 : f32 to vector<16x1xf32>
    %330 = arith.addf %328, %329 : vector<16x1xf32>
    %331 = vector.broadcast %330 : vector<16x1xf32> to vector<16x32xf32>
    %332 = arith.divf %327, %331 : vector<16x32xf32>
    %333 = vector.broadcast %310 : vector<1x32xf32> to vector<16x32xf32>
    %334 = arith.addf %332, %333 : vector<16x32xf32>
    %335 = vector.extract_strided_slice %334 {offsets = [0, 0], sizes = [8, 32], strides = [1, 1]} : vector<16x32xf32> to vector<8x32xf32>
    %cst_135 = arith.constant dense<0.000000e+00> : vector<32xf32>
    %336 = vector.multi_reduction <add>, %335, %cst_135 [0] : vector<8x32xf32> to vector<32xf32>
    %337 = vector.shape_cast %336 : vector<32xf32> to vector<1x32xf32>
    %cst_136 = arith.constant 8.000000e+00 : f32
    %338 = vector.broadcast %cst_136 : f32 to vector<1x32xf32>
    %339 = arith.divf %337, %338 : vector<1x32xf32>
    %340 = vector.extract_strided_slice %334 {offsets = [8, 0], sizes = [8, 32], strides = [1, 1]} : vector<16x32xf32> to vector<8x32xf32>
    %cst_137 = arith.constant dense<0.000000e+00> : vector<32xf32>
    %341 = vector.multi_reduction <add>, %340, %cst_137 [0] : vector<8x32xf32> to vector<32xf32>
    %342 = vector.shape_cast %341 : vector<32xf32> to vector<1x32xf32>
    %cst_138 = arith.constant 8.000000e+00 : f32
    %343 = vector.broadcast %cst_138 : f32 to vector<1x32xf32>
    %344 = arith.divf %342, %343 : vector<1x32xf32>
    %345 = tpu.concatenate %339, %344 in 0 : vector<1x32xf32>, vector<1x32xf32> -> vector<2x32xf32>
    %cst_139 = arith.constant dense<0.000000e+00> : vector<2x16xf32>
    %346 = tpu.matmul %345, %311, %cst_139 {dimension_numbers = #tpu.dot_dimension_numbers<[1], [0], [0], [1], [0, 0, 1, 1], [], []>} : vector<2x32xf32>, vector<32x16xf32>, vector<2x16xf32> -> vector<2x16xf32>
    %347 = vector.broadcast %312 : vector<1x16xf32> to vector<2x16xf32>
    %348 = arith.addf %346, %347 : vector<2x16xf32>
    %c0_140 = arith.constant 0 : index
    %c0_141 = arith.constant 0 : index
    %349 = vector.load %arg2[%c0_140, %c0_141] : memref<2x16xf32, #tpu.memory_space<vmem>>, vector<2x16xf32>
    tpu.vector_store %arg2[%c0_140, %c0_141], %348 {strides = array<i32>} : memref<2x16xf32, #tpu.memory_space<vmem>>, vector<2x16xf32>,
    return
  }
}

</mosaic_0001>

<bundles_post_ra>
// kernel: tpu_custom_call.1
= control target key start
LH: loop header
LB: loop body
LE: loop exit
PB: predicated region body
PF: predicated region fallthrough
CT: control target
= control target key end

     0   :  { %7 = vsyncpa [#allocation4], 0  ;;  %s2703_s0 = inlined_call_operand.hbm [shape: f32[16,32], index: 0, kind: input, shape index: {}]   ;;  %s2704_s1 = inlined_call_operand.hbm [shape: f32[376,128], index: 1, kind: input, shape index: {}]   ;;  %s2705_s2 = inlined_call_operand.hbm [shape: f32[2,16], index: 2, kind: output, shape index: {}]  }
   0x1   :  { %8 = vsyncpa [#allocation7], 0 }
   0x2   :  { %9 = vsyncpa [#allocation5], 0  ;;  %s14_s11 = sshll.u32 %s2703_s0, 4  ;;  %s2283_s12 = smov [#allocation3]   ;;  %s15_s11 = int_to_ptr.hbm [resolvable:$true] %s14_s11 }
   0x3   :  { %s16_s13 = sshll.u32 %s2283_s12, 4  ;;  %s27_s16 = sshll.u32 %s2704_s1, 4  ;;  %s17_s13 = int_to_ptr.vmem [resolvable:$true] %s16_s13  ;;  %s28_s16 = int_to_ptr.hbm [resolvable:$true] %s27_s16 }
   0x4   :  { %s2284_s17 = smov 128   ;;  %s2285_s18 = smov 8  }
   0x5   :  { %22 = dma.hbm_to_vmem [thread:$0]  %s15_s11, 256, %s17_s13, [#allocation4], %s2284_s17, %s2284_s17, %s2285_s18  }
   0x6   :  { %s2286_s19 = smov [#allocation6]  }
   0x7   :  { %s29_s20 = sshll.u32 %s2286_s19, 4  ;;  %s30_s20 = int_to_ptr.vmem [resolvable:$true] %s29_s20 }
   0x8   :  { %35 = dma.hbm_to_vmem [thread:$0]  %s28_s16, 6016, %s30_s20, [#allocation7], %s2284_s17, %s2284_s17, %s2285_s18  }
   0x9   :  { %2277 = dma.done.wait [#allocation4], 256  }
   0xa   :  { %2278 = vsyncadd [#allocation4], 4294967040 }
   0xb   :  { %2279 = dma.done.wait [#allocation7], 6016  }
   0xc   :  { %2280 = vsyncadd [#allocation7], 4294961280  ;;  %vm74_vm0 = vcmask 261120   ;;  %v2326_v0 = vld [vmem:[#allocation3] sm:$0xff]  ;;  %v2328_v1 = vld [vmem:[#allocation3 + $0x8] sm:$0xff]  ;;  %v2287_v4 = vmov 32.0  }
   0xd   :  { %v75_v2 = vsel %vm74_vm0, %v2326_v0, 0.0  ;;  %v78_v3 = vsel %vm74_vm0, %v2328_v1, 0.0  ;;  %2097 = vrcp.f32 %v2287_v4  ;;  %v49_v21 = vld [vmem:[#allocation6 + $0x18] sm:$0xff]  ;;  %v48_v22 = vld [vmem:[#allocation6 + $0x10] sm:$0xff]  ;;  %v47_v23 = vld [vmem:[#allocation6 + $0x8] sm:$0xff]  ;;  %s2288_s0 = smov 88  }
   0xe   :  { %76 = vadd.xlane.f32.xlu0 %v75_v2  ;;  %183 = vmatpush.msra.mxu0 %v49_v21  ;;  %v46_v25 = vld [vmem:[#allocation6] sm:$0xff]  ;;  %s2289_s1 = smov 96   ;;  %s2290_s21 = smov 80   ;;  %vm197_vm14 = vcmask 64512   ;;  %vm597_vm15 = vcmask 130112  }
   0xf   :  { %v2078_v55 = vld [vmem:[#allocation6 + $0xa0] ss:$0 sm:$0xff]  ;;  %v2079_v63 = vld [vmem:[#allocation6 + $0xa1] ss:$0 sm:$0xff]  ;;  %s2291_s22 = smov 120   ;;  %s2292_s23 = smov 104  }
  0x10   :  { %184 = vmatpush.msra.mxu0 %v48_v22  ;;  %s2293_s24 = smov 112   ;;  %s2294_s25 = smov 72  }
  0x11   :  { %s2295_s26 = smov 64   ;;  %s2296_s27 = smov 56  }
  0x12   :  { %185 = vmatpush.msra.mxu0 %v47_v23  ;;  %s2297_s28 = smov 48   ;;  %s2298_s29 = smov 40  }
  0x13   :  { %v2098_v5 = vpop.eup %2097  ;;  %s2299_s30 = smov 16   ;;  %s2300_s3 = smov 24  }
  0x14   :  { %v82_v6 = vmul.f32 32.0, %v2098_v5  ;;  %vm86_vm1 = vweird.f32 %v2098_v5  ;;  %186 = vmatpush.msra.mxu0 %v46_v25  ;;  %s2302_s4 = smov [#allocation8]   ;;  %s1962_s8 = sshll.u32 %s2705_s2, 4  ;;  %s1963_s8 = int_to_ptr.hbm [resolvable:$true] %s1962_s8 }
  0x15   :  { %s1960_s5 = sshll.u32 %s2302_s4, 4  ;;  %s1961_s5 = int_to_ptr.vmem [resolvable:$true] %s1960_s5 }
  0x16   :  { %79 = vadd.xlane.f32.xlu0 %v78_v3  ;;  %v83_v7 = vsub.f32 1.0, %v82_v6 }
  0x18   :  { %v84_v8 = vmul.f32 %v2098_v5, %v83_v7 }
  0x1a   :  { %v85_v9 = vadd.f32 %v2098_v5, %v84_v8 }
  0x1c   :  { %v2334_v10 = vsel %vm86_vm1, %v2098_v5, %v85_v9  ;;  %vm660_vm1 = vcmask 195712  }
  0x81   :  { %v77_v11 = vpop.xlane.xlu0 %76 }
  0x82   :  { %v88_v12 = vmul.f32 %v2334_v10, %v77_v11 }
  0x84   :  { %v2338_v13 = vsub.f32 %v2326_v0, %v88_v12 }
  0x86   :  { %v92_v14 = vmul.f32 %v2338_v13, %v2338_v13  ;;  %v103_v61 = vmul.f32 %v2078_v55, %v2338_v13 }
  0x88   :  { %v94_v15 = vsel %vm74_vm0, %v92_v14, 0.0 }
  0x89   :  { %95 = vadd.xlane.f32.xlu1 %v94_v15  ;;  %v80_v16 = vpop.xlane.xlu0 %79 }
  0x8a   :  { %v89_v17 = vmul.f32 %v2334_v10, %v80_v16 }
  0x8c   :  { %v2345_v18 = vsub.f32 %v2328_v1, %v89_v17 }
  0x8e   :  { %v93_v19 = vmul.f32 %v2345_v18, %v2345_v18  ;;  %v104_v13 = vmul.f32 %v2078_v55, %v2345_v18 }
  0x90   :  { %v97_v20 = vsel %vm74_vm0, %v93_v19, 0.0  ;;  %v2080_v19 = vld [vmem:[#allocation6 + $0xa2] ss:$0 sm:$0xff] }
  0x91   :  { %98 = vadd.xlane.f32.xlu1 %v97_v20 }
  0xfc   :  { %v96_v24 = vpop.xlane.xlu1 %95 }
  0xfd   :  { %v100_v26 = vmul.f32 0.032258064, %v96_v24 }
  0xff   :  { %2099 = vrsqrt.f32 %v100_v26  ;;  %vm112_vm2 = vcmp.eq.f32.partialorder %v100_v26, inf  ;;  %v115_v39 = vand.u32 2147483648, %v100_v26  ;;  %vm114_vm3 = vcmp.eq.f32.partialorder %v100_v26, 0.0 }
 0x104   :  { %v99_v27 = vpop.xlane.xlu1 %98 }
 0x105   :  { %v2100_v28 = vpop.eup %2099  ;;  %v101_v29 = vmul.f32 0.032258064, %v99_v27 }
 0x106   :  { %v106_v30 = vmul.f32 %v2100_v28, %v100_v26 }
 0x107   :  { %2101 = vrsqrt.f32 %v101_v29  ;;  %vm124_vm4 = vcmp.eq.f32.partialorder %v101_v29, inf  ;;  %v127_v47 = vand.u32 2147483648, %v101_v29  ;;  %vm126_vm5 = vcmp.eq.f32.partialorder %v101_v29, 0.0 }
 0x108   :  { %v107_v31 = vmul.f32 %v2100_v28, %v106_v30 }
 0x10a   :  { %v108_v32 = vmul.f32 0.5, %v107_v31 }
 0x10c   :  { %v109_v33 = vsub.f32 1.5, %v108_v32 }
 0x10d   :  { %v2102_v34 = vpop.eup %2101 }
 0x10e   :  { %v110_v35 = vmul.f32 %v2100_v28, %v109_v33  ;;  %v118_v36 = vmul.f32 %v2102_v34, %v101_v29 }
 0x110   :  { %v111_v37 = vmul.f32 %v110_v35, %v100_v26  ;;  %v119_v38 = vmul.f32 %v2102_v34, %v118_v36 }
 0x112   :  { %v120_v40 = vmul.f32 0.5, %v119_v38  ;;  %v113_v41 = vsel %vm112_vm2, %v100_v26, %v111_v37  ;;  %vm723_vm2 = vcmask 261312  }
 0x113   :  { %v116_v42 = vsel %vm114_vm3, %v115_v39, %v113_v41 }
 0x114   :  { %v121_v43 = vsub.f32 1.5, %v120_v40  ;;  %v129_v44 = vadd.f32 1e-06, %v116_v42 }
 0x116   :  { %v122_v45 = vmul.f32 %v2102_v34, %v121_v43  ;;  %2103 = vrcp.f32 %v129_v44  ;;  %v142_v54 = vand.u32 2147483648, %v129_v44  ;;  %v140_v57 = vand.u32 2147483647, %v129_v44 }
 0x117   :  { %vm136_vm7 = vweird.f32 %v129_v44 }
 0x118   :  { %v123_v46 = vmul.f32 %v122_v45, %v101_v29  ;;  %v143_v60 = vor.u32 1.1754944e-38, %v142_v54  ;;  %vm141_vm9 = vcmp.eq.f32.partialorder %v140_v57, 8.507059e+37 }
 0x11a   :  { %v125_v48 = vsel %vm124_vm4, %v101_v29, %v123_v46 }
 0x11b   :  { %v128_v49 = vsel %vm126_vm5, %v127_v47, %v125_v48 }
 0x11c   :  { %v2104_v50 = vpop.eup %2103  ;;  %v130_v51 = vadd.f32 1e-06, %v128_v49 }
 0x11d   :  { %v132_v52 = vmul.f32 %v2104_v50, %v129_v44  ;;  %vm137_vm6 = vweird.f32 %v2104_v50 }
 0x11e   :  { %2105 = vrcp.f32 %v130_v51  ;;  %vm138_vm8 = vmor %vm136_vm7, %vm137_vm6  ;;  %v157_v6 = vand.u32 2147483648, %v130_v51  ;;  %v155_v9 = vand.u32 2147483647, %v130_v51  ;;  %vm151_vm11 = vweird.f32 %v130_v51 }
 0x11f   :  { %v133_v53 = vsub.f32 1.0, %v132_v52 }
 0x120   :  { %v158_v12 = vor.u32 1.1754944e-38, %v157_v6  ;;  %vm156_vm13 = vcmp.eq.f32.partialorder %v155_v9, 8.507059e+37 }
 0x121   :  { %v134_v56 = vmul.f32 %v2104_v50, %v133_v53 }
 0x123   :  { %v135_v58 = vadd.f32 %v2104_v50, %v134_v56 }
 0x124   :  { %v2106_v59 = vpop.eup %2105 }
 0x125   :  { %v139_v62 = vsel %vm138_vm8, %v2104_v50, %v135_v58  ;;  %v147_v2 = vmul.f32 %v2106_v59, %v130_v51  ;;  %vm152_vm10 = vweird.f32 %v2106_v59 }
 0x126   :  { %v144_v3 = vsel %vm141_vm9, %v143_v60, %v139_v62  ;;  %vm153_vm12 = vmor %vm151_vm11, %vm152_vm10 }
 0x127   :  { %v145_v4 = vmul.f32 %v144_v3, %v103_v61  ;;  %v148_v5 = vsub.f32 1.0, %v147_v2 }
 0x129   :  { %v162_v7 = vadd.f32 %v2079_v63, %v145_v4  ;;  %v149_v8 = vmul.f32 %v2106_v59, %v148_v5 }
 0x12b   :  { %1973 = vmatmul.msk.f32.vlgmr.msra.gmra.mxu0 %vm74_vm0, %v162_v7  ;;  %v150_v11 = vadd.f32 %v2106_v59, %v149_v8 }
 0x12d   :  { %v154_v14 = vsel %vm153_vm12, %v2106_v59, %v150_v11 }
 0x12e   :  { %v159_v15 = vsel %vm156_vm13, %v158_v12, %v154_v14 }
 0x12f   :  { %v160_v16 = vmul.f32 %v159_v15, %v104_v13 }
 0x131   :  { %v163_v17 = vadd.f32 %v2079_v63, %v160_v16 }
 0x133   :  { %1974 = vmatmul.msk.f32.gmra.mxu0 %vm74_vm0, %v163_v17 }
 0x1a8   :  { %v188_v20 = vpop.f32.mrf.mxu0 }
 0x1a9   :  { %v2354_v21 = vadd.f32 %v2080_v19, %v188_v20 }
 0x1ab   :  { %251 = vrot.lane.b32.xlu0 %v2354_v21, %s2288_s0  ;;  %195 = vrot.lane.b32.xlu2 %v2354_v21, %s2289_s1 }
 0x1ac   :  { %307 = vrot.lane.b32.xlu1 %v2354_v21, %s2290_s21 }
 0x1b0   :  { %v191_v18 = vpop.f32.mrf.mxu0 }
 0x1b1   :  { %v2362_v22 = vadd.f32 %v2080_v19, %v191_v18 }
 0x1b3   :  { %249 = vrot.lane.b32.xlu2 %v2354_v21, %s2291_s22  ;;  %277 = vrot.lane.b32.xlu0 %v2362_v22, %s2291_s22 }
 0x1b4   :  { %389 = vrot.lane.b32.xlu1 %v2362_v22, %s2292_s23 }
 0x1bb   :  { %305 = vrot.lane.b32.xlu2 %v2354_v21, %s2293_s24  ;;  %363 = vrot.lane.b32.xlu0 %v2354_v21, %s2294_s25 }
 0x1bc   :  { %361 = vrot.lane.b32.xlu1 %v2354_v21, %s2292_s23 }
 0x1c3   :  { %333 = vrot.lane.b32.xlu0 %v2362_v22, %s2293_s24  ;;  %223 = vrot.lane.b32.xlu2 %v2362_v22, %s2289_s1 }
 0x1cb   :  { %279 = vrot.lane.b32.xlu2 %v2362_v22, %s2288_s0 }
 0x1d3   :  { %391 = vrot.lane.b32.xlu2 %v2362_v22, %s2294_s25 }
 0x1db   :  { %335 = vrot.lane.b32.xlu2 %v2362_v22, %s2290_s21 }
 0x205   :  { %v196_v23 = vpop.permute.xlu2 %195 }
 0x206   :  { %1975 = vmatpush.xpose.msk.msra.mxu1 %vm197_vm14, %v196_v23 }
 0x209   :  { %1976 = vmatmul.msk.f32.vlgmr.msra.gmra.mxu1 %vm197_vm14, %v2354_v21 }
 0x20d   :  { %v250_v24 = vpop.permute.xlu2 %249 }
 0x215   :  { %v306_v25 = vpop.permute.xlu2 %305 }
 0x21d   :  { %v224_v26 = vpop.permute.xlu2 %223  ;;  %v252_v27 = vpop.permute.xlu0 %251 }
 0x21e   :  { %v308_v28 = vpop.permute.xlu1 %307  ;;  %1977 = vmatpush.xpose.msk.msra.mxu3 %vm197_vm14, %v224_v26 }
 0x21f   :  { %1983 = vmatpush.xpose.msk.msra.mxu2 %vm197_vm14, %v308_v28 }
 0x221   :  { %1978 = vmatmul.msk.f32.vlgmr.msra.gmra.mxu3 %vm197_vm14, %v2362_v22 }
 0x222   :  { %1979 = vmatpush.xpose.msk.msrb.mxu3 %vm197_vm14, %v252_v27  ;;  %1984 = vmatmul.msk.f32.vlgmr.msra.gmra.mxu2 %vm197_vm14, %v306_v25 }
 0x225   :  { %v280_v29 = vpop.permute.xlu2 %279  ;;  %v278_v30 = vpop.permute.xlu0 %277 }
 0x226   :  { %v390_v31 = vpop.permute.xlu1 %389  ;;  %1981 = vmatpush.xpose.msk.msrb.mxu1 %vm197_vm14, %v280_v29 }
 0x229   :  { %1980 = vmatmul.msk.f32.vlgmr.msrb.gmra.mxu3 %vm197_vm14, %v250_v24  ;;  %1982 = vmatmul.msk.f32.vlgmr.msrb.gmra.mxu1 %vm197_vm14, %v278_v30 }
 0x22d   :  { %v392_v32 = vpop.permute.xlu2 %391  ;;  %v364_v33 = vpop.permute.xlu0 %363 }
 0x22e   :  { %1987 = vmatpush.xpose.msk.msra.mxu1 %vm197_vm14, %v364_v33  ;;  %1989 = vmatpush.xpose.msk.msrb.mxu2 %vm197_vm14, %v392_v32  ;;  %v362_v34 = vpop.permute.xlu1 %361 }
 0x231   :  { %1988 = vmatmul.msk.f32.vlgmr.msra.gmra.mxu1 %vm197_vm14, %v362_v34  ;;  %1990 = vmatmul.msk.f32.vlgmr.msrb.gmra.mxu2 %vm197_vm14, %v390_v31 }
 0x235   :  { %v336_v35 = vpop.permute.xlu2 %335  ;;  %v334_v36 = vpop.permute.xlu0 %333 }
 0x236   :  { %1985 = vmatpush.xpose.msk.msra.mxu3 %vm197_vm14, %v336_v35 }
 0x239   :  { %1986 = vmatmul.msk.f32.vlgmr.msra.gmra.mxu3 %vm197_vm14, %v334_v36 }
 0x286   :  { %v219_v37 = vpop.f32.mrf.mxu1 }
 0x287   :  { %v417_v38 = vmul.f32 0.35355338, %v219_v37  ;;  %v2058_v37 = vpack.i.bf16 %v2362_v22, %v2354_v21 }
 0x289   :  { %v425_v39 = vsel %vm197_vm14, %v417_v38, -inf }
 0x28a   :  { %426 = vmax.xlane.f32.xlu2 %v425_v39 }
 0x2a4   :  { %v246_v40 = vpop.f32.mrf.mxu3 }
 0x2a5   :  { %v418_v41 = vmul.f32 0.35355338, %v246_v40  ;;  %v330_v42 = vpop.f32.mrf.mxu2 }
 0x2a6   :  { %v421_v43 = vmul.f32 0.35355338, %v330_v42  ;;  %v302_v44 = vpop.f32.mrf.mxu1 }
 0x2a7   :  { %v420_v45 = vmul.f32 0.35355338, %v302_v44  ;;  %v428_v46 = vsel %vm197_vm14, %v418_v41, -inf }
 0x2a8   :  { %429 = vmax.xlane.f32.xlu1 %v428_v46  ;;  %v437_v47 = vsel %vm197_vm14, %v421_v43, -inf }
 0x2a9   :  { %438 = vmax.xlane.f32.xlu0 %v437_v47  ;;  %v434_v48 = vsel %vm197_vm14, %v420_v45, -inf }
 0x2aa   :  { %435 = vmax.xlane.f32.xlu2 %v434_v48 }
 0x2ac   :  { %v274_v49 = vpop.f32.mrf.mxu3 }
 0x2ad   :  { %v419_v50 = vmul.f32 0.35355338, %v274_v49 }
 0x2ae   :  { %v386_v51 = vpop.f32.mrf.mxu1 }
 0x2af   :  { %v423_v52 = vmul.f32 0.35355338, %v386_v51  ;;  %v431_v53 = vsel %vm197_vm14, %v419_v50, -inf }
 0x2b0   :  { %432 = vmax.xlane.f32.xlu1 %v431_v53 }
 0x2b1   :  { %v443_v54 = vsel %vm197_vm14, %v423_v52, -inf }
 0x2b2   :  { %444 = vmax.xlane.f32.xlu0 %v443_v54 }
 0x2b4   :  { %v414_v55 = vpop.f32.mrf.mxu2 }
 0x2b5   :  { %v424_v56 = vmul.f32 0.35355338, %v414_v55 }
 0x2b7   :  { %v446_v57 = vsel %vm197_vm14, %v424_v56, -inf }
 0x2b8   :  { %447 = vmax.xlane.f32.xlu2 %v446_v57 }
 0x2bc   :  { %v358_v58 = vpop.f32.mrf.mxu3 }
 0x2bd   :  { %v2411_v59 = vmul.f32 0.35355338, %v358_v58 }
 0x2bf   :  { %v440_v60 = vsel %vm197_vm14, %v2411_v59, -inf }
 0x2c0   :  { %441 = vmax.xlane.f32.xlu1 %v440_v60 }
 0x2fd   :  { %v427_v61 = vpop.xlane.xlu2 %426 }
 0x2fe   :  { %v449_v62 = vsub.f32 %v417_v38, %v427_v61 }
 0x300   :  { %v457_v63 = vmul.f32 1.442695, %v449_v62 }
 0x302   :  { %2107 = vpow2.f32 %v457_v63 }
 0x308   :  { %v2415_v2 = vpop.eup %2107 }
 0x309   :  { %v473_v3 = vsel %vm197_vm14, %v2415_v2, 0.0 }
 0x30a   :  { %474 = vadd.xlane.f32.xlu0 %v473_v3 }
 0x31b   :  { %v430_v4 = vpop.xlane.xlu1 %429 }
 0x31c   :  { %v439_v5 = vpop.xlane.xlu0 %438  ;;  %v450_v9 = vsub.f32 %v418_v41, %v430_v4 }
 0x31d   :  { %v453_v6 = vsub.f32 %v421_v43, %v439_v5  ;;  %v436_v7 = vpop.xlane.xlu2 %435 }
 0x31e   :  { %v452_v8 = vsub.f32 %v420_v45, %v436_v7  ;;  %v459_v13 = vmul.f32 1.442695, %v450_v9 }
 0x31f   :  { %v465_v11 = vmul.f32 1.442695, %v453_v6 }
 0x320   :  { %v463_v12 = vmul.f32 1.442695, %v452_v8 }
 0x321   :  { %2109 = vpow2.f32 %v465_v11 }
 0x322   :  { %2111 = vpow2.f32 %v463_v12 }
 0x323   :  { %v433_v14 = vpop.xlane.xlu1 %432  ;;  %2113 = vpow2.f32 %v459_v13 }
 0x324   :  { %v451_v15 = vsub.f32 %v419_v50, %v433_v14 }
 0x325   :  { %v445_v16 = vpop.xlane.xlu0 %444 }
 0x326   :  { %v461_v17 = vmul.f32 1.442695, %v451_v15  ;;  %v455_v19 = vsub.f32 %v423_v52, %v445_v16 }
 0x327   :  { %v2419_v20 = vpop.eup %2109 }
 0x328   :  { %v2421_v18 = vpop.eup %2111  ;;  %2115 = vpow2.f32 %v461_v17  ;;  %v469_v23 = vmul.f32 1.442695, %v455_v19  ;;  %v485_v24 = vsel %vm197_vm14, %v2419_v20, 0.0 }
 0x329   :  { %486 = vadd.xlane.f32.xlu1 %v485_v24  ;;  %v482_v25 = vsel %vm197_vm14, %v2421_v18, 0.0  ;;  %v2427_v28 = vpop.eup %2113  ;;  %v53_v24 = vld [vmem:[#allocation6 + $0x38] sm:$0xff] }
 0x32a   :  { %2117 = vpow2.f32 %v469_v23  ;;  %483 = vadd.xlane.f32.xlu0 %v482_v25  ;;  %v476_v33 = vsel %vm197_vm14, %v2427_v28, 0.0  ;;  %v52_v25 = vld [vmem:[#allocation6 + $0x30] sm:$0xff] }
 0x32b   :  { %v448_v26 = vpop.xlane.xlu2 %447 }
 0x32c   :  { %v456_v27 = vsub.f32 %v424_v56, %v448_v26  ;;  %v51_v26 = vld [vmem:[#allocation6 + $0x28] sm:$0xff] }
 0x32e   :  { %v2116_v29 = vpop.eup %2115  ;;  %v471_v30 = vmul.f32 1.442695, %v456_v27  ;;  %v50_v27 = vld [vmem:[#allocation6 + $0x20] sm:$0xff] }
 0x32f   :  { %v479_v31 = vsel %vm197_vm14, %v2116_v29, 0.0 }
 0x330   :  { %v2430_v32 = vpop.eup %2117  ;;  %2119 = vpow2.f32 %v471_v30  ;;  %480 = vadd.xlane.f32.xlu2 %v479_v31 }
 0x331   :  { %477 = vadd.xlane.f32.xlu1 %v476_v33  ;;  %v491_v34 = vsel %vm197_vm14, %v2430_v32, 0.0 }
 0x332   :  { %492 = vadd.xlane.f32.xlu0 %v491_v34 }
 0x333   :  { %v442_v38 = vpop.xlane.xlu1 %441 }
 0x334   :  { %v454_v39 = vsub.f32 %v2411_v59, %v442_v38 }
 0x336   :  { %v2436_v35 = vpop.eup %2119  ;;  %v467_v40 = vmul.f32 1.442695, %v454_v39 }
 0x337   :  { %v494_v36 = vsel %vm197_vm14, %v2436_v35, 0.0 }
 0x338   :  { %2121 = vpow2.f32 %v467_v40 }
 0x33a   :  { %495 = vadd.xlane.f32.xlu0 %v494_v36  ;;  %v2081_v36 = vld [vmem:[#allocation6 + $0xa3] ss:$0 sm:$0xff] }
 0x33e   :  { %v2122_v41 = vpop.eup %2121 }
 0x33f   :  { %v488_v42 = vsel %vm197_vm14, %v2122_v41, 0.0 }
 0x348   :  { %513 = vrot.lane.b32.xlu2 %v2354_v21, %s2295_s26 }
 0x34a   :  { %2059 = vrot.lane.b32.xlu1 %v2058_v37, %s2296_s27 }
 0x34e   :  { %630 = vrot.lane.b32.xlu0 %v2354_v21, %s2297_s28 }
 0x352   :  { %540 = vrot.lane.b32.xlu1 %v2362_v22, %s2295_s26 }
 0x356   :  { %2064 = vrot.lane.b32.xlu0 %v2058_v37, %s2298_s29 }
 0x35a   :  { %662 = vrot.lane.b32.xlu1 %v2362_v22, %s2297_s28 }
 0x371   :  { %489 = vadd.xlane.f32.xlu2 %v488_v42 }
 0x37d   :  { %v475_v43 = vpop.xlane.xlu0 %474 }
 0x37e   :  { %2123 = vrcp.f32 %v475_v43 }
 0x384   :  { %v2124_v45 = vpop.eup %2123 }
 0x385   :  { %v505_v47 = vmul.f32 %v2124_v45, %v2415_v2 }
 0x39c   :  { %v487_v46 = vpop.xlane.xlu1 %486 }
 0x39d   :  { %v484_v44 = vpop.xlane.xlu0 %483 }
 0x39e   :  { %2125 = vrcp.f32 %v484_v44 }
 0x3a3   :  { %v481_v21 = vpop.xlane.xlu2 %480 }
 0x3a4   :  { %v478_v49 = vpop.xlane.xlu1 %477  ;;  %2127 = vrcp.f32 %v481_v21  ;;  %v2126_v51 = vpop.eup %2125 }
 0x3a5   :  { %v493_v22 = vpop.xlane.xlu0 %492  ;;  %2129 = vrcp.f32 %v487_v46  ;;  %v508_v57 = vmul.f32 %v2126_v51, %v2421_v18 }
 0x3a6   :  { %2131 = vrcp.f32 %v478_v49 }
 0x3a7   :  { %2133 = vrcp.f32 %v493_v22 }
 0x3aa   :  { %v2128_v52 = vpop.eup %2127 }
 0x3ab   :  { %v514_v48 = vpop.permute.xlu2 %513  ;;  %v2130_v54 = vpop.eup %2129  ;;  %v507_v58 = vmul.f32 %v2128_v52, %v2116_v29 }
 0x3ac   :  { %534 = vmatpush.msrb.mxu3 %v514_v48  ;;  %v509_v59 = vmul.f32 %v2130_v54, %v2419_v20  ;;  %v2132_v61 = vpop.eup %2131 }
 0x3ad   :  { %1991 = vmatmul.msk.f32.vlgmr.msrb.gmra.mxu3 %vm197_vm14, %v505_v47  ;;  %v496_v50 = vpop.xlane.xlu0 %495  ;;  %v506_v63 = vmul.f32 %v2132_v61, %v2427_v28  ;;  %v2134_v2 = vpop.eup %2133 }
 0x3ae   :  { %2135 = vrcp.f32 %v496_v50  ;;  %v511_v7 = vmul.f32 %v2134_v2, %v2430_v32 }
 0x3b4   :  { %v2136_v3 = vpop.eup %2135 }
 0x3b5   :  { %v512_v8 = vmul.f32 %v2136_v3, %v2436_v35 }
 0x3bc   :  { %v2060_v53 = vpop.permute.xlu1 %2059 }
 0x3bd   :  { %v2062_v55 = vunpack.i.h.bf16 %v2060_v53  ;;  %v2061_v56 = vunpack.i.l.bf16 %v2060_v53  ;;  %v57_v53 = vld [vmem:[#allocation6 + $0x58] sm:$0xff] }
 0x3bf   :  { %588 = vmatpush.msrb.mxu1 %v2061_v56  ;;  %620 = vmatpush.msra.mxu2 %v2062_v55  ;;  %v56_v56 = vld [vmem:[#allocation6 + $0x50] sm:$0xff] }
 0x3c0   :  { %1993 = vmatmul.msk.f32.vlgmr.msrb.gmra.mxu1 %vm197_vm14, %v507_v58  ;;  %1994 = vmatmul.msk.f32.vlgmr.msra.gmra.mxu2 %vm197_vm14, %v508_v57  ;;  %v631_v60 = vpop.permute.xlu0 %630  ;;  %v55_v58 = vld [vmem:[#allocation6 + $0x48] sm:$0xff] }
 0x3c1   :  { %651 = vmatpush.msra.mxu3 %v631_v60  ;;  %v54_v60 = vld [vmem:[#allocation6 + $0x40] sm:$0xff] }
 0x3c2   :  { %1995 = vmatmul.msk.f32.vlgmr.msra.gmra.mxu3 %vm197_vm14, %v509_v59 }
 0x3c3   :  { %777 = vmatpush.msrb.mxu3 %v53_v24 }
 0x3c4   :  { %v541_v62 = vpop.permute.xlu1 %540 }
 0x3c5   :  { %561 = vmatpush.msrb.mxu0 %v541_v62  ;;  %778 = vmatpush.msrb.mxu3 %v52_v25 }
 0x3c6   :  { %1992 = vmatmul.msk.f32.vlgmr.msrb.gmra.mxu0 %vm197_vm14, %v506_v63 }
 0x3c7   :  { %779 = vmatpush.msrb.mxu3 %v51_v26 }
 0x3c8   :  { %v2065_v4 = vpop.permute.xlu0 %2064 }
 0x3c9   :  { %v2067_v5 = vunpack.i.h.bf16 %v2065_v4  ;;  %v2066_v6 = vunpack.i.l.bf16 %v2065_v4  ;;  %780 = vmatpush.msrb.mxu3 %v50_v27 }
 0x3cb   :  { %714 = vmatpush.msra.mxu1 %v2066_v6  ;;  %746 = vmatpush.msrb.mxu2 %v2067_v5 }
 0x3cc   :  { %v663_v9 = vpop.permute.xlu1 %662  ;;  %1997 = vmatmul.msk.f32.vlgmr.msra.gmra.mxu1 %vm197_vm14, %v511_v7  ;;  %1998 = vmatmul.msk.f32.vlgmr.msrb.gmra.mxu2 %vm197_vm14, %v512_v8 }
 0x3cd   :  { %683 = vmatpush.msra.mxu0 %v663_v9 }
 0x3cf   :  { %891 = vmatpush.msrb.mxu0 %v57_v53 }
 0x3d1   :  { %892 = vmatpush.msrb.mxu0 %v56_v56  ;;  %v58_v56 = vld [vmem:[#allocation6 + $0x60] sm:$0xff] }
 0x3d3   :  { %893 = vmatpush.msrb.mxu0 %v55_v58 }
 0x3d5   :  { %894 = vmatpush.msrb.mxu0 %v54_v60 }
 0x3e4   :  { %v490_v11 = vpop.xlane.xlu2 %489 }
 0x3e5   :  { %2137 = vrcp.f32 %v490_v11 }
 0x3eb   :  { %v2138_v12 = vpop.eup %2137 }
 0x3ec   :  { %v510_v13 = vmul.f32 %v2138_v12, %v2122_v41 }
 0x3ee   :  { %1996 = vmatmul.msk.f32.vlgmr.msra.gmra.mxu0 %vm197_vm14, %v510_v13  ;;  %v2082_v13 = vld [vmem:[#allocation6 + $0xa4] ss:$0 sm:$0xff] }
 0x430   :  { %v536_v14 = vpop.f32.mrf.mxu3 }
 0x431   :  { %539 = vst.msk [vmem:[#allocation2] sm:$0xff] %vm197_vm14, %v536_v14 }
 0x43d   :  { %v590_v15 = vpop.f32.mrf.mxu1 }
 0x43e   :  { %594 = vrot.lane.b32.xlu0 %v590_v15, %s2285_s18 }
 0x443   :  { %v563_v16 = vpop.f32.mrf.mxu0  ;;  %v622_v19 = vpop.f32.mrf.mxu2 }
 0x444   :  { %566 = vst.msk [vmem:[#allocation2 + $0x8] sm:$0xff] %vm197_vm14, %v563_v16 }
 0x445   :  { %v653_v17 = vpop.f32.mrf.mxu3 }
 0x446   :  { %657 = vrot.lane.b32.xlu1 %v653_v17, %s2299_s30 }
 0x449   :  { %v716_v20 = vpop.f32.mrf.mxu1 }
 0x44a   :  { %720 = vrot.lane.b32.xlu0 %v716_v20, %s2300_s3 }
 0x44e   :  { %626 = vrot.lane.b32.xlu1 %v622_v19, %s2285_s18 }
 0x44f   :  { %v748_v18 = vpop.f32.mrf.mxu2 }
 0x450   :  { %752 = vrot.lane.b32.xlu2 %v748_v18, %s2300_s3  ;;  %v2083_v18 = vld [vmem:[#allocation6 + $0xa5] ss:$0 sm:$0xff] }
 0x46b   :  { %v685_v23 = vpop.f32.mrf.mxu0 }
 0x46c   :  { %689 = vrot.lane.b32.xlu0 %v685_v23, %s2299_s30 }
 0x4aa   :  { %v753_v34 = vpop.permute.xlu2 %752 }
 0x4b0   :  { %v595_v28 = vpop.permute.xlu0 %594 }
 0x4b1   :  { %598 = vst.msk [vmem:[#allocation2] sm:$0xff] %vm597_vm15, %v595_v28 }
 0x4b8   :  { %v658_v29 = vpop.permute.xlu1 %657 }
 0x4b9   :  { %661 = vst.msk [vmem:[#allocation2] sm:$0xff] %vm660_vm1, %v658_v29 }
 0x4bc   :  { %v721_v30 = vpop.permute.xlu0 %720 }
 0x4bd   :  { %724 = vst.msk [vmem:[#allocation2] sm:$0xff] %vm723_vm2, %v721_v30  ;;  %v65_v30 = vld [vmem:[#allocation6 + $0x98] sm:$0xff] }
 0x4be   :  { %920 = vmatpush.msrb.mxu1 %v65_v30  ;;  %v937_v30 = vld [vmem:[#allocation6 + $0xa8] sm:$0xff] }
 0x4c0   :  { %v627_v31 = vpop.permute.xlu1 %626 }
 0x4c1   :  { %629 = vst.msk [vmem:[#allocation2 + $0x8] sm:$0xff] %vm597_vm15, %v627_v31  ;;  %v64_v31 = vld [vmem:[#allocation6 + $0x90] sm:$0xff] }
 0x4c2   :  { %921 = vmatpush.msrb.mxu1 %v64_v31 }
 0x4c4   :  { %v756_v32 = vld [vmem:[#allocation2] sm:$0xff] }
 0x4c5   :  { %1999 = vmatmul.msk.f32.vlgmr.msrb.gmra.mxu3 %vm74_vm0, %v756_v32 }
 0x4de   :  { %v690_v33 = vpop.permute.xlu0 %689 }
 0x4df   :  { %692 = vst.msk [vmem:[#allocation2 + $0x8] sm:$0xff] %vm660_vm1, %v690_v33  ;;  %v63_v33 = vld [vmem:[#allocation6 + $0x88] sm:$0xff] }
 0x4e0   :  { %755 = vst.msk [vmem:[#allocation2 + $0x8] sm:$0xff] %vm723_vm2, %v753_v34  ;;  %922 = vmatpush.msrb.mxu1 %v63_v33 }
 0x4e7   :  { %v757_v35 = vld [vmem:[#allocation2 + $0x8] sm:$0xff] }
 0x4e8   :  { %2000 = vmatmul.msk.f32.gmra.mxu3 %vm74_vm0, %v757_v35  ;;  %v62_v35 = vld [vmem:[#allocation6 + $0x80] sm:$0xff] }
 0x4e9   :  { %923 = vmatpush.msrb.mxu1 %v62_v35 }
 0x548   :  { %v782_v37 = vpop.f32.mrf.mxu3 }
 0x549   :  { %v783_v38 = vadd.f32 %v2081_v36, %v782_v37 }
 0x54b   :  { %v2485_v39 = vadd.f32 %v783_v38, %v2326_v0  ;;  %v61_v38 = vld [vmem:[#allocation6 + $0x78] sm:$0xff] }
 0x54c   :  { %924 = vmatpush.msrb.mxu1 %v61_v38 }
 0x54d   :  { %v790_v40 = vsel %vm74_vm0, %v2485_v39, 0.0 }
 0x54e   :  { %791 = vadd.xlane.f32.xlu1 %v790_v40 }
 0x56b   :  { %v785_v41 = vpop.f32.mrf.mxu3 }
 0x56c   :  { %v786_v42 = vadd.f32 %v2081_v36, %v785_v41 }
 0x56e   :  { %v2490_v43 = vadd.f32 %v786_v42, %v2328_v1 }
 0x570   :  { %v793_v21 = vsel %vm74_vm0, %v2490_v43, 0.0 }
 0x571   :  { %794 = vadd.xlane.f32.xlu0 %v793_v21 }
 0x5c1   :  { %v792_v44 = vpop.xlane.xlu1 %791 }
 0x5c2   :  { %v796_v45 = vmul.f32 %v792_v44, %v2334_v10 }
 0x5c4   :  { %v798_v46 = vsub.f32 %v2485_v39, %v796_v45 }
 0x5c6   :  { %v800_v0 = vmul.f32 %v798_v46, %v798_v46  ;;  %v811_v19 = vmul.f32 %v2082_v13, %v798_v46 }
 0x5c8   :  { %v802_v47 = vsel %vm74_vm0, %v800_v0, 0.0 }
 0x5c9   :  { %803 = vadd.xlane.f32.xlu2 %v802_v47 }
 0x5e4   :  { %v795_v48 = vpop.xlane.xlu0 %794 }
 0x5e5   :  { %v797_v22 = vmul.f32 %v795_v48, %v2334_v10 }
 0x5e7   :  { %v2499_v49 = vsub.f32 %v2490_v43, %v797_v22 }
 0x5e9   :  { %v801_v1 = vmul.f32 %v2499_v49, %v2499_v49 }
 0x5eb   :  { %v805_v50 = vsel %vm74_vm0, %v801_v1, 0.0  ;;  %v812_v1 = vmul.f32 %v2082_v13, %v2499_v49 }
 0x5ec   :  { %806 = vadd.xlane.f32.xlu1 %v805_v50 }
 0x63c   :  { %v804_v51 = vpop.xlane.xlu2 %803 }
 0x63d   :  { %v808_v52 = vmul.f32 0.032258064, %v804_v51 }
 0x63f   :  { %2139 = vrsqrt.f32 %v808_v52  ;;  %vm820_vm3 = vcmp.eq.f32.partialorder %v808_v52, inf  ;;  %v823_v2 = vand.u32 2147483648, %v808_v52  ;;  %vm822_vm4 = vcmp.eq.f32.partialorder %v808_v52, 0.0 }
 0x645   :  { %v2140_v54 = vpop.eup %2139 }
 0x646   :  { %v814_v55 = vmul.f32 %v2140_v54, %v808_v52 }
 0x648   :  { %v815_v57 = vmul.f32 %v2140_v54, %v814_v55  ;;  %v59_v55 = vld [vmem:[#allocation6 + $0x68] sm:$0xff] }
 0x64a   :  { %v816_v59 = vmul.f32 0.5, %v815_v57  ;;  %v2084_v57 = vld [vmem:[#allocation6 + $0xa6] ss:$0 sm:$0xff] }
 0x64c   :  { %v817_v61 = vsub.f32 1.5, %v816_v59 }
 0x64e   :  { %v818_v62 = vmul.f32 %v2140_v54, %v817_v61  ;;  %v60_v54 = vld [vmem:[#allocation6 + $0x70] sm:$0xff] }
 0x64f   :  { %925 = vmatpush.msrb.mxu1 %v60_v54 }
 0x650   :  { %v819_v63 = vmul.f32 %v818_v62, %v808_v52 }
 0x651   :  { %926 = vmatpush.msrb.mxu1 %v59_v55 }
 0x652   :  { %v821_v3 = vsel %vm820_vm3, %v808_v52, %v819_v63  ;;  %v2085_v63 = vld [vmem:[#allocation6 + $0xa7] ss:$0 sm:$0xff] }
 0x653   :  { %v824_v4 = vsel %vm822_vm4, %v823_v2, %v821_v3  ;;  %927 = vmatpush.msrb.mxu1 %v58_v56  ;;  %vm905_vm4 = vcmask 523264  }
 0x654   :  { %v837_v5 = vadd.f32 1e-06, %v824_v4 }
 0x656   :  { %2141 = vrcp.f32 %v837_v5  ;;  %v850_v12 = vand.u32 2147483648, %v837_v5  ;;  %v848_v15 = vand.u32 2147483647, %v837_v5  ;;  %vm844_vm6 = vweird.f32 %v837_v5 }
 0x658   :  { %v851_v17 = vor.u32 1.1754944e-38, %v850_v12  ;;  %vm849_vm8 = vcmp.eq.f32.partialorder %v848_v15, 8.507059e+37 }
 0x65c   :  { %v2142_v6 = vpop.eup %2141 }
 0x65d   :  { %v840_v7 = vmul.f32 %v2142_v6, %v837_v5  ;;  %vm845_vm5 = vweird.f32 %v2142_v6 }
 0x65e   :  { %vm846_vm7 = vmor %vm844_vm6, %vm845_vm5 }
 0x65f   :  { %v807_v8 = vpop.xlane.xlu1 %806  ;;  %v841_v9 = vsub.f32 1.0, %v840_v7 }
 0x660   :  { %v809_v11 = vmul.f32 0.032258064, %v807_v8 }
 0x661   :  { %v842_v14 = vmul.f32 %v2142_v6, %v841_v9 }
 0x662   :  { %2143 = vrsqrt.f32 %v809_v11  ;;  %vm832_vm9 = vcmp.eq.f32.partialorder %v809_v11, inf  ;;  %v835_v37 = vand.u32 2147483648, %v809_v11  ;;  %vm834_vm10 = vcmp.eq.f32.partialorder %v809_v11, 0.0 }
 0x663   :  { %v843_v16 = vadd.f32 %v2142_v6, %v842_v14 }
 0x665   :  { %v847_v20 = vsel %vm846_vm7, %v2142_v6, %v843_v16 }
 0x666   :  { %v852_v23 = vsel %vm849_vm8, %v851_v17, %v847_v20 }
 0x667   :  { %v853_v24 = vmul.f32 %v852_v23, %v811_v19  ;;  %v940_v23 = vld [vmem:[#allocation6 + $0xc0] sm:$0xff] }
 0x668   :  { %v2144_v25 = vpop.eup %2143  ;;  %1066 = vmatpush.msra.mxu2 %v940_v23 }
 0x669   :  { %v826_v26 = vmul.f32 %v2144_v25, %v809_v11  ;;  %v870_v27 = vadd.f32 %v2083_v18, %v853_v24 }
 0x66b   :  { %v827_v28 = vmul.f32 %v2144_v25, %v826_v26  ;;  %2001 = vmatmul.msk.f32.vlgmr.msrb.gmra.mxu0 %vm74_vm0, %v870_v27  ;;  %v939_v26 = vld [vmem:[#allocation6 + $0xb8] sm:$0xff] }
 0x66c   :  { %1067 = vmatpush.msra.mxu2 %v939_v26 }
 0x66d   :  { %v828_v29 = vmul.f32 0.5, %v827_v28  ;;  %v938_v28 = vld [vmem:[#allocation6 + $0xb0] sm:$0xff] }
 0x66e   :  { %1068 = vmatpush.msra.mxu2 %v938_v28 }
 0x66f   :  { %v829_v32 = vsub.f32 1.5, %v828_v29 }
 0x670   :  { %1069 = vmatpush.msra.mxu2 %v937_v30 }
 0x671   :  { %v830_v34 = vmul.f32 %v2144_v25, %v829_v32 }
 0x673   :  { %v831_v36 = vmul.f32 %v830_v34, %v809_v11 }
 0x675   :  { %v833_v40 = vsel %vm832_vm9, %v809_v11, %v831_v36 }
 0x676   :  { %v836_v41 = vsel %vm834_vm10, %v835_v37, %v833_v40 }
 0x677   :  { %v838_v42 = vadd.f32 1e-06, %v836_v41 }
 0x679   :  { %2145 = vrcp.f32 %v838_v42  ;;  %v865_v46 = vand.u32 2147483648, %v838_v42  ;;  %v863_v47 = vand.u32 2147483647, %v838_v42  ;;  %vm859_vm12 = vweird.f32 %v838_v42 }
 0x67b   :  { %v866_v22 = vor.u32 1.1754944e-38, %v865_v46  ;;  %vm864_vm3 = vcmp.eq.f32.partialorder %v863_v47, 8.507059e+37 }
 0x67f   :  { %v2146_v21 = vpop.eup %2145 }
 0x680   :  { %v855_v44 = vmul.f32 %v2146_v21, %v838_v42  ;;  %vm860_vm11 = vweird.f32 %v2146_v21 }
 0x681   :  { %vm861_vm13 = vmor %vm859_vm12, %vm860_vm11 }
 0x682   :  { %v856_v45 = vsub.f32 1.0, %v855_v44 }
 0x684   :  { %v857_v0 = vmul.f32 %v2146_v21, %v856_v45  ;;  %v2086_v45 = vld [vmem:[#allocation6 + $0x148] ss:$0 sm:$0xff] }
 0x686   :  { %v858_v48 = vadd.f32 %v2146_v21, %v857_v0 }
 0x688   :  { %v862_v50 = vsel %vm861_vm13, %v2146_v21, %v858_v48 }
 0x689   :  { %v867_v51 = vsel %vm864_vm3, %v866_v22, %v862_v50  ;;  %v2087_v50 = vld [vmem:[#allocation6 + $0x149] ss:$0 sm:$0xff] }
 0x68a   :  { %v868_v52 = vmul.f32 %v867_v51, %v812_v1 }
 0x68c   :  { %v871_v53 = vadd.f32 %v2083_v18, %v868_v52 }
 0x68e   :  { %2002 = vmatmul.msk.f32.gmra.mxu0 %vm74_vm0, %v871_v53 }
 0x6e8   :  { %v896_v58 = vpop.f32.mrf.mxu0 }
 0x6e9   :  { %v897_v59 = vadd.f32 %v2084_v57, %v896_v58 }
 0x6eb   :  { %v902_v60 = vmax.f32 %v897_v59, 0.0 }
 0x6ed   :  { %2003 = vmatmul.msk.f32.vlgmr.msrb.gmra.mxu1 %vm905_vm4, %v902_v60 }
 0x70b   :  { %v899_v49 = vpop.f32.mrf.mxu0 }
 0x70c   :  { %v900_v61 = vadd.f32 %v2084_v57, %v899_v49 }
 0x70e   :  { %v903_v62 = vmax.f32 %v900_v61, 0.0 }
 0x710   :  { %2004 = vmatmul.msk.f32.gmra.mxu1 %vm905_vm4, %v903_v62 }
 0x76a   :  { %v929_v2 = vpop.f32.mrf.mxu1 }
 0x76b   :  { %v930_v3 = vadd.f32 %v2085_v63, %v929_v2 }
 0x76d   :  { %v2510_v4 = vadd.f32 %v930_v3, %v2485_v39 }
 0x76f   :  { %v965_v5 = vsel %vm74_vm0, %v2510_v4, 0.0 }
 0x770   :  { %966 = vadd.xlane.f32.xlu0 %v965_v5 }
 0x78d   :  { %v932_v6 = vpop.f32.mrf.mxu1 }
 0x78e   :  { %v933_v7 = vadd.f32 %v2085_v63, %v932_v6 }
 0x790   :  { %v2515_v8 = vadd.f32 %v933_v7, %v2490_v43 }
 0x792   :  { %v968_v9 = vsel %vm74_vm0, %v2515_v8, 0.0 }
 0x793   :  { %969 = vadd.xlane.f32.xlu1 %v968_v9 }
 0x7e3   :  { %v967_v11 = vpop.xlane.xlu0 %966 }
 0x7e4   :  { %v971_v12 = vmul.f32 %v967_v11, %v2334_v10 }
 0x7e6   :  { %v973_v13 = vsub.f32 %v2510_v4, %v971_v12 }
 0x7e8   :  { %v975_v39 = vmul.f32 %v973_v13, %v973_v13  ;;  %v986_v22 = vmul.f32 %v2086_v45, %v973_v13 }
 0x7ea   :  { %v977_v14 = vsel %vm74_vm0, %v975_v39, 0.0 }
 0x7eb   :  { %978 = vadd.xlane.f32.xlu0 %v977_v14 }
 0x806   :  { %v970_v15 = vpop.xlane.xlu1 %969 }
 0x807   :  { %v972_v16 = vmul.f32 %v970_v15, %v2334_v10 }
 0x809   :  { %v2524_v17 = vsub.f32 %v2515_v8, %v972_v16 }
 0x80b   :  { %v976_v43 = vmul.f32 %v2524_v17, %v2524_v17  ;;  %v987_v13 = vmul.f32 %v2086_v45, %v2524_v17 }
 0x80d   :  { %v980_v19 = vsel %vm74_vm0, %v976_v43, 0.0  ;;  %v2088_v43 = vld [vmem:[#allocation6 + $0x14a] ss:$0 sm:$0xff] }
 0x80e   :  { %981 = vadd.xlane.f32.xlu1 %v980_v19 }
 0x85e   :  { %v979_v20 = vpop.xlane.xlu0 %978 }
 0x85f   :  { %v983_v18 = vmul.f32 0.032258064, %v979_v20 }
 0x861   :  { %2147 = vrsqrt.f32 %v983_v18  ;;  %vm995_vm5 = vcmp.eq.f32.partialorder %v983_v18, inf  ;;  %v998_v34 = vand.u32 2147483648, %v983_v18  ;;  %vm997_vm6 = vcmp.eq.f32.partialorder %v983_v18, 0.0 }
 0x867   :  { %v2148_v24 = vpop.eup %2147 }
 0x868   :  { %v989_v25 = vmul.f32 %v2148_v24, %v983_v18 }
 0x86a   :  { %v990_v27 = vmul.f32 %v2148_v24, %v989_v25 }
 0x86c   :  { %v991_v29 = vmul.f32 0.5, %v990_v27 }
 0x86e   :  { %v992_v31 = vsub.f32 1.5, %v991_v29 }
 0x870   :  { %v993_v32 = vmul.f32 %v2148_v24, %v992_v31 }
 0x872   :  { %v994_v33 = vmul.f32 %v993_v32, %v983_v18 }
 0x874   :  { %v996_v35 = vsel %vm995_vm5, %v983_v18, %v994_v33 }
 0x875   :  { %v999_v36 = vsel %vm997_vm6, %v998_v34, %v996_v35 }
 0x876   :  { %v1012_v37 = vadd.f32 1e-06, %v999_v36 }
 0x878   :  { %2149 = vrcp.f32 %v1012_v37  ;;  %v1025_v44 = vand.u32 2147483648, %v1012_v37  ;;  %v1023_v0 = vand.u32 2147483647, %v1012_v37  ;;  %vm1019_vm8 = vweird.f32 %v1012_v37 }
 0x87a   :  { %v1026_v48 = vor.u32 1.1754944e-38, %v1025_v44  ;;  %vm1024_vm10 = vcmp.eq.f32.partialorder %v1023_v0, 8.507059e+37 }
 0x87e   :  { %v2150_v38 = vpop.eup %2149 }
 0x87f   :  { %v1015_v40 = vmul.f32 %v2150_v38, %v1012_v37  ;;  %vm1020_vm7 = vweird.f32 %v2150_v38 }
 0x880   :  { %vm1021_vm9 = vmor %vm1019_vm8, %vm1020_vm7 }
 0x881   :  { %v982_v41 = vpop.xlane.xlu1 %981  ;;  %v1016_v42 = vsub.f32 1.0, %v1015_v40 }
 0x882   :  { %v984_v21 = vmul.f32 0.032258064, %v982_v41 }
 0x883   :  { %v1017_v46 = vmul.f32 %v2150_v38, %v1016_v42 }
 0x884   :  { %2151 = vrsqrt.f32 %v984_v21  ;;  %vm1007_vm11 = vcmp.eq.f32.partialorder %v984_v21, inf  ;;  %v1010_v49 = vand.u32 2147483648, %v984_v21  ;;  %vm1009_vm12 = vcmp.eq.f32.partialorder %v984_v21, 0.0 }
 0x885   :  { %v1018_v47 = vadd.f32 %v2150_v38, %v1017_v46 }
 0x887   :  { %v1022_v1 = vsel %vm1021_vm9, %v2150_v38, %v1018_v47 }
 0x888   :  { %v1027_v51 = vsel %vm1024_vm10, %v1026_v48, %v1022_v1 }
 0x889   :  { %v1028_v52 = vmul.f32 %v1027_v51, %v986_v22 }
 0x88a   :  { %v2152_v53 = vpop.eup %2151 }
 0x88b   :  { %v1001_v54 = vmul.f32 %v2152_v53, %v984_v21  ;;  %v1045_v55 = vadd.f32 %v2087_v50, %v1028_v52 }
 0x88d   :  { %v1002_v56 = vmul.f32 %v2152_v53, %v1001_v54  ;;  %2005 = vmatmul.msk.f32.vlgmr.msra.gmra.mxu2 %vm74_vm0, %v1045_v55 }
 0x88f   :  { %v1003_v57 = vmul.f32 0.5, %v1002_v56 }
 0x891   :  { %v1004_v58 = vsub.f32 1.5, %v1003_v57 }
 0x893   :  { %v1005_v59 = vmul.f32 %v2152_v53, %v1004_v58 }
 0x895   :  { %v1006_v60 = vmul.f32 %v1005_v59, %v984_v21 }
 0x897   :  { %v1008_v61 = vsel %vm1007_vm11, %v984_v21, %v1006_v60 }
 0x898   :  { %v1011_v62 = vsel %vm1009_vm12, %v1010_v49, %v1008_v61 }
 0x899   :  { %v1013_v63 = vadd.f32 1e-06, %v1011_v62 }
 0x89b   :  { %2153 = vrcp.f32 %v1013_v63  ;;  %v1040_v6 = vand.u32 2147483648, %v1013_v63  ;;  %v1038_v9 = vand.u32 2147483647, %v1013_v63  ;;  %vm1034_vm3 = vweird.f32 %v1013_v63 }
 0x89d   :  { %v1041_v12 = vor.u32 1.1754944e-38, %v1040_v6  ;;  %vm1039_vm6 = vcmp.eq.f32.partialorder %v1038_v9, 8.507059e+37 }
 0x8a1   :  { %v2154_v2 = vpop.eup %2153 }
 0x8a2   :  { %v1030_v3 = vmul.f32 %v2154_v2, %v1013_v63  ;;  %vm1035_vm13 = vweird.f32 %v2154_v2 }
 0x8a3   :  { %vm1036_vm5 = vmor %vm1034_vm3, %vm1035_vm13 }
 0x8a4   :  { %v1031_v5 = vsub.f32 1.0, %v1030_v3 }
 0x8a6   :  { %v1032_v7 = vmul.f32 %v2154_v2, %v1031_v5 }
 0x8a8   :  { %v1033_v11 = vadd.f32 %v2154_v2, %v1032_v7 }
 0x8aa   :  { %v1037_v39 = vsel %vm1036_vm5, %v2154_v2, %v1033_v11 }
 0x8ab   :  { %v1042_v14 = vsel %vm1039_vm6, %v1041_v12, %v1037_v39 }
 0x8ac   :  { %v1043_v15 = vmul.f32 %v1042_v14, %v987_v13 }
 0x8ae   :  { %v1046_v16 = vadd.f32 %v2087_v50, %v1043_v15 }
 0x8b0   :  { %2006 = vmatmul.msk.f32.gmra.mxu2 %vm74_vm0, %v1046_v16 }
 0x910   :  { %v1071_v19 = vpop.f32.mrf.mxu2 }
 0x911   :  { %v2532_v20 = vadd.f32 %v2088_v43, %v1071_v19 }
 0x913   :  { %1131 = vrot.lane.b32.xlu1 %v2532_v20, %s2291_s22  ;;  %1133 = vrot.lane.b32.xlu0 %v2532_v20, %s2288_s0 }
 0x914   :  { %1078 = vrot.lane.b32.xlu2 %v2532_v20, %s2289_s1 }
 0x91c   :  { %1245 = vrot.lane.b32.xlu2 %v2532_v20, %s2294_s25 }
 0x924   :  { %1243 = vrot.lane.b32.xlu2 %v2532_v20, %s2292_s23 }
 0x933   :  { %v1074_v17 = vpop.f32.mrf.mxu2 }
 0x934   :  { %v2544_v18 = vadd.f32 %v2088_v43, %v1074_v17 }
 0x936   :  { %1105 = vrot.lane.b32.xlu1 %v2544_v18, %s2289_s1  ;;  %1161 = vrot.lane.b32.xlu0 %v2544_v18, %s2288_s0  ;;  %v2073_v60 = vpack.i.bf16 %v2544_v18, %v2532_v20 }
 0x937   :  { %1271 = vrot.lane.b32.xlu2 %v2544_v18, %s2292_s23 }
 0x93e   :  { %1273 = vrot.lane.b32.xlu1 %v2544_v18, %s2294_s25  ;;  %1159 = vrot.lane.b32.xlu0 %v2544_v18, %s2291_s22 }
 0x93f   :  { %1215 = vrot.lane.b32.xlu2 %v2544_v18, %s2293_s24 }
 0x946   :  { %1187 = vrot.lane.b32.xlu1 %v2532_v20, %s2293_s24  ;;  %1189 = vrot.lane.b32.xlu0 %v2532_v20, %s2290_s21 }
 0x94e   :  { %1217 = vrot.lane.b32.xlu0 %v2544_v18, %s2290_s21 }
 0x96e   :  { %v1079_v23 = vpop.permute.xlu2 %1078 }
 0x96f   :  { %2007 = vmatpush.xpose.msk.msra.mxu3 %vm197_vm14, %v1079_v23 }
 0x972   :  { %2008 = vmatmul.msk.f32.vlgmr.msra.gmra.mxu3 %vm197_vm14, %v2532_v20 }
 0x976   :  { %v1246_v25 = vpop.permute.xlu2 %1245 }
 0x97e   :  { %v1244_v27 = vpop.permute.xlu2 %1243 }
 0x985   :  { %v1134_v24 = vpop.permute.xlu0 %1133  ;;  %v1132_v26 = vpop.permute.xlu1 %1131 }
 0x986   :  { %2011 = vmatpush.xpose.msk.msrb.mxu2 %vm197_vm14, %v1134_v24 }
 0x989   :  { %2012 = vmatmul.msk.f32.vlgmr.msrb.gmra.mxu2 %vm197_vm14, %v1132_v26 }
 0x98a   :  { %2019 = vmatpush.xpose.msk.msra.mxu2 %vm197_vm14, %v1246_v25 }
 0x991   :  { %2020 = vmatmul.msk.f32.vlgmr.msra.gmra.mxu2 %vm197_vm14, %v1244_v27  ;;  %v1272_v32 = vpop.permute.xlu2 %1271 }
 0x999   :  { %v1216_v36 = vpop.permute.xlu2 %1215 }
 0x9a8   :  { %v1106_v28 = vpop.permute.xlu1 %1105  ;;  %v1162_v29 = vpop.permute.xlu0 %1161 }
 0x9a9   :  { %2009 = vmatpush.xpose.msk.msra.mxu0 %vm197_vm14, %v1106_v28  ;;  %2013 = vmatpush.xpose.msk.msrb.mxu3 %vm197_vm14, %v1162_v29 }
 0x9ac   :  { %2010 = vmatmul.msk.f32.vlgmr.msra.gmra.mxu0 %vm197_vm14, %v2544_v18 }
 0x9b0   :  { %v1274_v30 = vpop.permute.xlu1 %1273  ;;  %v1160_v31 = vpop.permute.xlu0 %1159 }
 0x9b1   :  { %2014 = vmatmul.msk.f32.vlgmr.msrb.gmra.mxu3 %vm197_vm14, %v1160_v31 }
 0x9b2   :  { %2021 = vmatpush.xpose.msk.msra.mxu3 %vm197_vm14, %v1274_v30 }
 0x9b8   :  { %v1190_v33 = vpop.permute.xlu0 %1189  ;;  %v1188_v34 = vpop.permute.xlu1 %1187 }
 0x9b9   :  { %2015 = vmatpush.xpose.msk.msrb.mxu0 %vm197_vm14, %v1190_v33  ;;  %2022 = vmatmul.msk.f32.vlgmr.msra.gmra.mxu3 %vm197_vm14, %v1272_v32 }
 0x9bc   :  { %2016 = vmatmul.msk.f32.vlgmr.msrb.gmra.mxu0 %vm197_vm14, %v1188_v34 }
 0x9c0   :  { %v1218_v35 = vpop.permute.xlu0 %1217 }
 0x9c1   :  { %2017 = vmatpush.xpose.msk.msra.mxu1 %vm197_vm14, %v1218_v35 }
 0x9c4   :  { %2018 = vmatmul.msk.f32.vlgmr.msra.gmra.mxu1 %vm197_vm14, %v1216_v36 }
 0x9f5   :  { %v1101_v37 = vpop.f32.mrf.mxu3 }
 0x9f6   :  { %v1299_v38 = vmul.f32 0.35355338, %v1101_v37 }
 0x9f8   :  { %v1307_v40 = vsel %vm197_vm14, %v1299_v38, -inf }
 0x9f9   :  { %1308 = vmax.xlane.f32.xlu0 %v1307_v40 }
 0xa0c   :  { %v1156_v41 = vpop.f32.mrf.mxu2 }
 0xa0d   :  { %v1301_v42 = vmul.f32 0.35355338, %v1156_v41 }
 0xa0f   :  { %v1313_v21 = vsel %vm197_vm14, %v1301_v42, -inf }
 0xa10   :  { %1314 = vmax.xlane.f32.xlu1 %v1313_v21 }
 0xa14   :  { %v1268_v44 = vpop.f32.mrf.mxu2 }
 0xa15   :  { %v1305_v45 = vmul.f32 0.35355338, %v1268_v44 }
 0xa17   :  { %v1325_v46 = vsel %vm197_vm14, %v1305_v45, -inf }
 0xa18   :  { %1326 = vmax.xlane.f32.xlu1 %v1325_v46 }
 0xa29   :  { %v1128_v0 = vpop.f32.mrf.mxu0 }
 0xa2a   :  { %v1300_v47 = vmul.f32 0.35355338, %v1128_v0 }
 0xa2c   :  { %v1310_v48 = vsel %vm197_vm14, %v1300_v47, -inf }
 0xa2d   :  { %1311 = vmax.xlane.f32.xlu0 %v1310_v48 }
 0xa34   :  { %v1184_v22 = vpop.f32.mrf.mxu3 }
 0xa35   :  { %v2586_v1 = vmul.f32 0.35355338, %v1184_v22 }
 0xa37   :  { %v1316_v50 = vsel %vm197_vm14, %v2586_v1, -inf }
 0xa38   :  { %1317 = vmax.xlane.f32.xlu2 %v1316_v50 }
 0xa39   :  { %v1212_v51 = vpop.f32.mrf.mxu0 }
 0xa3a   :  { %v1303_v52 = vmul.f32 0.35355338, %v1212_v51 }
 0xa3c   :  { %v1296_v53 = vpop.f32.mrf.mxu3  ;;  %v1319_v55 = vsel %vm197_vm14, %v1303_v52, -inf }
 0xa3d   :  { %v1306_v54 = vmul.f32 0.35355338, %v1296_v53 }
 0xa3f   :  { %v1328_v56 = vsel %vm197_vm14, %v1306_v54, -inf }
 0xa40   :  { %1320 = vmax.xlane.f32.xlu2 %v1319_v55  ;;  %1329 = vmax.xlane.f32.xlu1 %v1328_v56 }
 0xa41   :  { %v1240_v57 = vpop.f32.mrf.mxu1 }
 0xa42   :  { %v1304_v58 = vmul.f32 0.35355338, %v1240_v57 }
 0xa44   :  { %v1322_v59 = vsel %vm197_vm14, %v1304_v58, -inf }
 0xa45   :  { %1323 = vmax.xlane.f32.xlu0 %v1322_v59 }
 0xa59   :  { %2074 = vrot.lane.b32.xlu0 %v2073_v60, %s2295_s26 }
 0xa6c   :  { %v1309_v49 = vpop.xlane.xlu0 %1308 }
 0xa6d   :  { %v1331_v61 = vsub.f32 %v1299_v38, %v1309_v49 }
 0xa6f   :  { %v1339_v62 = vmul.f32 1.442695, %v1331_v61 }
 0xa71   :  { %2155 = vpow2.f32 %v1339_v62 }
 0xa77   :  { %v2596_v63 = vpop.eup %2155 }
 0xa78   :  { %v1355_v2 = vsel %vm197_vm14, %v2596_v63, 0.0 }
 0xa79   :  { %1356 = vadd.xlane.f32.xlu1 %v1355_v2 }
 0xa83   :  { %v1315_v3 = vpop.xlane.xlu1 %1314 }
 0xa84   :  { %v1333_v5 = vsub.f32 %v1301_v42, %v1315_v3 }
 0xa86   :  { %v1343_v6 = vmul.f32 1.442695, %v1333_v5 }
 0xa88   :  { %2157 = vpow2.f32 %v1343_v6 }
 0xa8b   :  { %v1327_v17 = vpop.xlane.xlu1 %1326 }
 0xa8c   :  { %v1337_v23 = vsub.f32 %v1305_v45, %v1327_v17 }
 0xa8e   :  { %v2600_v7 = vpop.eup %2157  ;;  %v1351_v25 = vmul.f32 1.442695, %v1337_v23 }
 0xa8f   :  { %v1361_v9 = vsel %vm197_vm14, %v2600_v7, 0.0 }
 0xa90   :  { %1362 = vadd.xlane.f32.xlu2 %v1361_v9 }
 0xa92   :  { %2069 = vrot.lane.b32.xlu1 %v2073_v60, %s2296_s27 }
 0xaa0   :  { %v1312_v11 = vpop.xlane.xlu0 %1311 }
 0xaa1   :  { %v1332_v12 = vsub.f32 %v1300_v47, %v1312_v11 }
 0xaa3   :  { %v1341_v13 = vmul.f32 1.442695, %v1332_v12 }
 0xaa5   :  { %2159 = vpow2.f32 %v1341_v13 }
 0xaa8   :  { %1573 = vrot.lane.b32.xlu2 %v2532_v20, %s2298_s29 }
 0xaab   :  { %v2607_v39 = vpop.eup %2159  ;;  %v1318_v43 = vpop.xlane.xlu2 %1317 }
 0xaac   :  { %v1358_v14 = vsel %vm197_vm14, %v2607_v39, 0.0  ;;  %v1334_v40 = vsub.f32 %v2586_v1, %v1318_v43 }
 0xaad   :  { %1359 = vadd.xlane.f32.xlu0 %v1358_v14 }
 0xaae   :  { %v1345_v42 = vmul.f32 1.442695, %v1334_v40 }
 0xab3   :  { %v1321_v26 = vpop.xlane.xlu2 %1320  ;;  %v1330_v31 = vpop.xlane.xlu1 %1329 }
 0xab4   :  { %v1335_v28 = vsub.f32 %v1303_v52, %v1321_v26  ;;  %v1338_v35 = vsub.f32 %v1306_v54, %v1330_v31  ;;  %v943_v26 = vld [vmem:[#allocation6 + $0xd8] sm:$0xff] }
 0xab6   :  { %v1347_v29 = vmul.f32 1.442695, %v1335_v28  ;;  %v1353_v36 = vmul.f32 1.442695, %v1338_v35  ;;  %v941_v28 = vld [vmem:[#allocation6 + $0xc8] sm:$0xff] }
 0xab8   :  { %v1324_v15 = vpop.xlane.xlu0 %1323 }
 0xab9   :  { %v1336_v16 = vsub.f32 %v1304_v58, %v1324_v15 }
 0xabb   :  { %v1349_v19 = vmul.f32 1.442695, %v1336_v16 }
 0xabd   :  { %2161 = vpow2.f32 %v1349_v19 }
 0xabe   :  { %2163 = vpow2.f32 %v1351_v25  ;;  %v944_v25 = vld [vmem:[#allocation6 + $0xe0] sm:$0xff] }
 0xabf   :  { %2165 = vpow2.f32 %v1347_v29 }
 0xac0   :  { %2167 = vpow2.f32 %v1353_v36 }
 0xac1   :  { %1511 = vrot.lane.b32.xlu0 %v2532_v20, %s2297_s28  ;;  %2169 = vpow2.f32 %v1345_v42 }
 0xac3   :  { %v2613_v24 = vpop.eup %2161 }
 0xac4   :  { %v1370_v27 = vsel %vm197_vm14, %v2613_v24, 0.0  ;;  %v2164_v34 = vpop.eup %2163 }
 0xac5   :  { %1371 = vadd.xlane.f32.xlu1 %v1370_v27  ;;  %v1373_v20 = vsel %vm197_vm14, %v2164_v34, 0.0  ;;  %v2166_v37 = vpop.eup %2165  ;;  %v942_v27 = vld [vmem:[#allocation6 + $0xd0] sm:$0xff] }
 0xac6   :  { %v1367_v38 = vsel %vm197_vm14, %v2166_v37, 0.0  ;;  %v2168_v41 = vpop.eup %2167 }
 0xac7   :  { %v1376_v21 = vsel %vm197_vm14, %v2168_v41, 0.0  ;;  %v2170_v44 = vpop.eup %2169 }
 0xac8   :  { %v1364_v45 = vsel %vm197_vm14, %v2170_v44, 0.0 }
 0xacb   :  { %v2075_v30 = vpop.permute.xlu0 %2074 }
 0xacc   :  { %v2077_v32 = vunpack.i.h.bf16 %v2075_v30  ;;  %v2076_v33 = vunpack.i.l.bf16 %v2075_v30 }
 0xace   :  { %1416 = vmatpush.msra.mxu0 %v2076_v33  ;;  %1443 = vmatpush.msrb.mxu1 %v2077_v32 }
 0xad1   :  { %1374 = vadd.xlane.f32.xlu2 %v1373_v20  ;;  %v2089_v20 = vld [vmem:[#allocation6 + $0x14b] ss:$0 sm:$0xff] }
 0xad9   :  { %1368 = vadd.xlane.f32.xlu2 %v1367_v38 }
 0xae1   :  { %1377 = vadd.xlane.f32.xlu2 %v1376_v21 }
 0xaeb   :  { %1365 = vadd.xlane.f32.xlu0 %v1364_v45 }
 0xaec   :  { %v1357_v46 = vpop.xlane.xlu1 %1356 }
 0xaed   :  { %2171 = vrcp.f32 %v1357_v46 }
 0xaf3   :  { %v2172_v0 = vpop.eup %2171 }
 0xaf4   :  { %v1387_v47 = vmul.f32 %v2172_v0, %v2596_v63 }
 0xaf6   :  { %2023 = vmatmul.msk.f32.vlgmr.msra.gmra.mxu0 %vm197_vm14, %v1387_v47 }
 0xaf9   :  { %1542 = vrot.lane.b32.xlu2 %v2544_v18, %s2297_s28 }
 0xaff   :  { %1604 = vrot.lane.b32.xlu0 %v2544_v18, %s2298_s29 }
 0xb03   :  { %v1363_v48 = vpop.xlane.xlu2 %1362 }
 0xb04   :  { %v2070_v22 = vpop.permute.xlu1 %2069  ;;  %2173 = vrcp.f32 %v1363_v48 }
 0xb05   :  { %v2072_v1 = vunpack.i.h.bf16 %v2070_v22  ;;  %v2071_v50 = vunpack.i.l.bf16 %v2070_v22 }
 0xb07   :  { %1470 = vmatpush.msrb.mxu2 %v2071_v50  ;;  %1501 = vmatpush.msrb.mxu3 %v2072_v1 }
 0xb0a   :  { %v2174_v51 = vpop.eup %2173 }
 0xb0b   :  { %v1389_v52 = vmul.f32 %v2174_v51, %v2600_v7  ;;  %v1574_v53 = vpop.permute.xlu2 %1573 }
 0xb0c   :  { %1594 = vmatpush.msra.mxu2 %v1574_v53  ;;  %v948_v53 = vld [vmem:[#allocation6 + $0x100] sm:$0xff] }
 0xb0d   :  { %2025 = vmatmul.msk.f32.vlgmr.msrb.gmra.mxu2 %vm197_vm14, %v1389_v52 }
 0xb20   :  { %v1360_v54 = vpop.xlane.xlu0 %1359 }
 0xb21   :  { %2175 = vrcp.f32 %v1360_v54 }
 0xb27   :  { %v2176_v55 = vpop.eup %2175 }
 0xb28   :  { %v1388_v56 = vmul.f32 %v2176_v55, %v2607_v39 }
 0xb2a   :  { %2024 = vmatmul.msk.f32.vlgmr.msrb.gmra.mxu1 %vm197_vm14, %v1388_v56  ;;  %v947_v56 = vld [vmem:[#allocation6 + $0xf8] sm:$0xff] }
 0xb33   :  { %v1512_v18 = vpop.permute.xlu0 %1511 }
 0xb34   :  { %1532 = vmatpush.msrb.mxu0 %v1512_v18 }
 0xb36   :  { %1656 = vmatpush.msra.mxu0 %v944_v25 }
 0xb38   :  { %v1372_v49 = vpop.xlane.xlu1 %1371  ;;  %1657 = vmatpush.msra.mxu0 %v943_v26 }
 0xb3a   :  { %1658 = vmatpush.msra.mxu0 %v942_v27 }
 0xb3c   :  { %1659 = vmatpush.msra.mxu0 %v941_v28 }
 0xb44   :  { %v1375_v57 = vpop.xlane.xlu2 %1374 }
 0xb45   :  { %2177 = vrcp.f32 %v1375_v57  ;;  %v946_v57 = vld [vmem:[#allocation6 + $0xf0] sm:$0xff] }
 0xb4b   :  { %v2178_v58 = vpop.eup %2177 }
 0xb4c   :  { %v1393_v59 = vmul.f32 %v2178_v58, %v2164_v34  ;;  %v1369_v60 = vpop.xlane.xlu2 %1368 }
 0xb4d   :  { %2179 = vrcp.f32 %v1369_v60 }
 0xb4e   :  { %2029 = vmatmul.msk.f32.vlgmr.msra.gmra.mxu2 %vm197_vm14, %v1393_v59  ;;  %2181 = vrcp.f32 %v1372_v49  ;;  %v945_v59 = vld [vmem:[#allocation6 + $0xe8] sm:$0xff] }
 0xb53   :  { %v2180_v61 = vpop.eup %2179 }
 0xb54   :  { %v1391_v62 = vmul.f32 %v2180_v61, %v2166_v37  ;;  %v1378_v63 = vpop.xlane.xlu2 %1377  ;;  %v2182_v2 = vpop.eup %2181 }
 0xb55   :  { %v1392_v3 = vmul.f32 %v2182_v2, %v2613_v24 }
 0xb56   :  { %2027 = vmatmul.msk.f32.vlgmr.msrb.gmra.mxu0 %vm197_vm14, %v1391_v62 }
 0xb5c   :  { %v1543_v5 = vpop.permute.xlu2 %1542 }
 0xb5d   :  { %1563 = vmatpush.msra.mxu1 %v1543_v5 }
 0xb5e   :  { %v1366_v6 = vpop.xlane.xlu0 %1365  ;;  %2028 = vmatmul.msk.f32.vlgmr.msra.gmra.mxu1 %vm197_vm14, %v1392_v3 }
 0xb5f   :  { %2183 = vrcp.f32 %v1366_v6  ;;  %1770 = vmatpush.msrb.mxu1 %v948_v53 }
 0xb60   :  { %2185 = vrcp.f32 %v1378_v63 }
 0xb61   :  { %1771 = vmatpush.msrb.mxu1 %v947_v56  ;;  %v949_v56 = vld [vmem:[#allocation6 + $0x108] sm:$0xff] }
 0xb63   :  { %1772 = vmatpush.msrb.mxu1 %v946_v57 }
 0xb65   :  { %v2184_v7 = vpop.eup %2183  ;;  %1773 = vmatpush.msrb.mxu1 %v945_v59 }
 0xb66   :  { %v1390_v9 = vmul.f32 %v2184_v7, %v2170_v44  ;;  %v2186_v11 = vpop.eup %2185 }
 0xb67   :  { %v1394_v12 = vmul.f32 %v2186_v11, %v2168_v41  ;;  %v2090_v11 = vld [vmem:[#allocation6 + $0x14c] ss:$0 sm:$0xff] }
 0xb68   :  { %2026 = vmatmul.msk.f32.vlgmr.msrb.gmra.mxu3 %vm197_vm14, %v1390_v9 }
 0xb71   :  { %v1605_v13 = vpop.permute.xlu0 %1604 }
 0xb72   :  { %1625 = vmatpush.msra.mxu3 %v1605_v13 }
 0xb73   :  { %v1418_v39 = vpop.f32.mrf.mxu0  ;;  %2030 = vmatmul.msk.f32.vlgmr.msra.gmra.mxu3 %vm197_vm14, %v1394_v12 }
 0xb74   :  { %1421 = vst.msk [vmem:[#allocation2] sm:$0xff] %vm197_vm14, %v1418_v39 }
 0xb90   :  { %v1472_v14 = vpop.f32.mrf.mxu2 }
 0xb91   :  { %1476 = vrot.lane.b32.xlu0 %v1472_v14, %s2285_s18 }
 0xba7   :  { %v1445_v15 = vpop.f32.mrf.mxu1 }
 0xba8   :  { %1448 = vst.msk [vmem:[#allocation2 + $0x8] sm:$0xff] %vm197_vm14, %v1445_v15 }
 0xbd1   :  { %v1596_v16 = vpop.f32.mrf.mxu2 }
 0xbd2   :  { %1600 = vrot.lane.b32.xlu0 %v1596_v16, %s2300_s3 }
 0xbd3   :  { %v1534_v43 = vpop.f32.mrf.mxu0 }
 0xbd4   :  { %1538 = vrot.lane.b32.xlu2 %v1534_v43, %s2299_s30 }
 0xbdb   :  { %v1565_v19 = vpop.f32.mrf.mxu1 }
 0xbdc   :  { %1569 = vrot.lane.b32.xlu0 %v1565_v19, %s2299_s30 }
 0xbeb   :  { %v1503_v17 = vpop.f32.mrf.mxu3 }
 0xbec   :  { %1507 = vrot.lane.b32.xlu2 %v1503_v17, %s2285_s18  ;;  %v2091_v17 = vld [vmem:[#allocation6 + $0x14d] ss:$0 sm:$0xff] }
 0xbf6   :  { %v1627_v23 = vpop.f32.mrf.mxu3 }
 0xbf7   :  { %1631 = vrot.lane.b32.xlu1 %v1627_v23, %s2300_s3 }
 0xc03   :  { %v1477_v24 = vpop.permute.xlu0 %1476 }
 0xc04   :  { %1479 = vst.msk [vmem:[#allocation2] sm:$0xff] %vm597_vm15, %v1477_v24 }
 0xc2e   :  { %v1539_v29 = vpop.permute.xlu2 %1538 }
 0xc2f   :  { %1541 = vst.msk [vmem:[#allocation2] sm:$0xff] %vm660_vm1, %v1539_v29 }
 0xc44   :  { %v1601_v30 = vpop.permute.xlu0 %1600 }
 0xc45   :  { %1603 = vst.msk [vmem:[#allocation2] sm:$0xff] %vm723_vm2, %v1601_v30  ;;  %v956_v30 = vld [vmem:[#allocation6 + $0x140] sm:$0xff] }
 0xc46   :  { %v1508_v31 = vpop.permute.xlu2 %1507  ;;  %1798 = vmatpush.msrb.mxu2 %v956_v30 }
 0xc47   :  { %1510 = vst.msk [vmem:[#allocation2 + $0x8] sm:$0xff] %vm597_vm15, %v1508_v31  ;;  %v955_v31 = vld [vmem:[#allocation6 + $0x138] sm:$0xff] }
 0xc48   :  { %1799 = vmatpush.msrb.mxu2 %v955_v31 }
 0xc4c   :  { %v1635_v32 = vld [vmem:[#allocation2] sm:$0xff] }
 0xc4d   :  { %2031 = vmatmul.msk.f32.vlgmr.msra.gmra.mxu0 %vm74_vm0, %v1635_v32 }
 0xc4e   :  { %v1570_v33 = vpop.permute.xlu0 %1569 }
 0xc4f   :  { %1572 = vst.msk [vmem:[#allocation2 + $0x8] sm:$0xff] %vm660_vm1, %v1570_v33  ;;  %v954_v33 = vld [vmem:[#allocation6 + $0x130] sm:$0xff] }
 0xc50   :  { %1800 = vmatpush.msrb.mxu2 %v954_v33  ;;  %v1820_v33 = vld [vmem:[#allocation6 + $0x168] sm:$0xff] }
 0xc51   :  { %1945 = vmatpush.msrb.mxu3 %v1820_v33 }
 0xc69   :  { %v1632_v34 = vpop.permute.xlu1 %1631 }
 0xc6a   :  { %1634 = vst.msk [vmem:[#allocation2 + $0x8] sm:$0xff] %vm723_vm2, %v1632_v34 }
 0xc71   :  { %v1636_v35 = vld [vmem:[#allocation2 + $0x8] sm:$0xff] }
 0xc72   :  { %2032 = vmatmul.msk.f32.gmra.mxu0 %vm74_vm0, %v1636_v35  ;;  %v953_v35 = vld [vmem:[#allocation6 + $0x128] sm:$0xff] }
 0xc73   :  { %1801 = vmatpush.msrb.mxu2 %v953_v35  ;;  %v1818_v35 = vld [vmem:[#allocation6 + $0x158] sm:$0xff] }
 0xcca   :  { %v1661_v36 = vpop.f32.mrf.mxu0 }
 0xccb   :  { %v1662_v37 = vadd.f32 %v2089_v20, %v1661_v36 }
 0xccd   :  { %v2655_v38 = vadd.f32 %v1662_v37, %v2510_v4  ;;  %v952_v37 = vld [vmem:[#allocation6 + $0x120] sm:$0xff] }
 0xcce   :  { %1802 = vmatpush.msrb.mxu2 %v952_v37 }
 0xccf   :  { %v1669_v40 = vsel %vm74_vm0, %v2655_v38, 0.0 }
 0xcd0   :  { %1670 = vadd.xlane.f32.xlu2 %v1669_v40 }
 0xcef   :  { %v1664_v41 = vpop.f32.mrf.mxu0 }
 0xcf0   :  { %v1665_v42 = vadd.f32 %v2089_v20, %v1664_v41 }
 0xcf2   :  { %v2660_v21 = vadd.f32 %v1665_v42, %v2515_v8 }
 0xcf4   :  { %v1672_v44 = vsel %vm74_vm0, %v2660_v21, 0.0 }
 0xcf5   :  { %1673 = vadd.xlane.f32.xlu0 %v1672_v44 }
 0xd43   :  { %v1671_v45 = vpop.xlane.xlu2 %1670 }
 0xd44   :  { %v1675_v46 = vmul.f32 %v1671_v45, %v2334_v10 }
 0xd46   :  { %v1677_v0 = vsub.f32 %v2655_v38, %v1675_v46 }
 0xd48   :  { %v1679_v4 = vmul.f32 %v1677_v0, %v1677_v0  ;;  %v1690_v43 = vmul.f32 %v2090_v11, %v1677_v0 }
 0xd4a   :  { %v1681_v47 = vsel %vm74_vm0, %v1679_v4, 0.0 }
 0xd4b   :  { %1682 = vadd.xlane.f32.xlu1 %v1681_v47 }
 0xd68   :  { %v1674_v48 = vpop.xlane.xlu0 %1673 }
 0xd69   :  { %v1676_v22 = vmul.f32 %v1674_v48, %v2334_v10 }
 0xd6b   :  { %v2669_v1 = vsub.f32 %v2660_v21, %v1676_v22 }
 0xd6d   :  { %v1680_v8 = vmul.f32 %v2669_v1, %v2669_v1 }
 0xd6f   :  { %v1684_v50 = vsel %vm74_vm0, %v1680_v8, 0.0  ;;  %v1691_v8 = vmul.f32 %v2090_v11, %v2669_v1 }
 0xd70   :  { %1685 = vadd.xlane.f32.xlu2 %v1684_v50 }
 0xdbe   :  { %v1683_v51 = vpop.xlane.xlu1 %1682 }
 0xdbf   :  { %v1687_v52 = vmul.f32 0.032258064, %v1683_v51 }
 0xdc1   :  { %2187 = vrsqrt.f32 %v1687_v52  ;;  %vm1699_vm14 = vcmp.eq.f32.partialorder %v1687_v52, inf  ;;  %v1702_v62 = vand.u32 2147483648, %v1687_v52  ;;  %vm1701_vm15 = vcmp.eq.f32.partialorder %v1687_v52, 0.0 }
 0xdc7   :  { %v2188_v54 = vpop.eup %2187 }
 0xdc8   :  { %v1693_v55 = vmul.f32 %v2188_v54, %v1687_v52 }
 0xdca   :  { %v1694_v18 = vmul.f32 %v2188_v54, %v1693_v55  ;;  %v950_v55 = vld [vmem:[#allocation6 + $0x110] sm:$0xff] }
 0xdcc   :  { %v1695_v58 = vmul.f32 0.5, %v1694_v18  ;;  %v2092_v18 = vld [vmem:[#allocation6 + $0x14e] ss:$0 sm:$0xff] }
 0xdce   :  { %v1696_v60 = vsub.f32 1.5, %v1695_v58 }
 0xdd0   :  { %v1697_v49 = vmul.f32 %v2188_v54, %v1696_v60  ;;  %v951_v54 = vld [vmem:[#allocation6 + $0x118] sm:$0xff] }
 0xdd1   :  { %1803 = vmatpush.msrb.mxu2 %v951_v54 }
 0xdd2   :  { %v1698_v61 = vmul.f32 %v1697_v49, %v1687_v52 }
 0xdd3   :  { %1804 = vmatpush.msrb.mxu2 %v950_v55 }
 0xdd4   :  { %v1700_v63 = vsel %vm1699_vm14, %v1687_v52, %v1698_v61  ;;  %v2093_v61 = vld [vmem:[#allocation6 + $0x14f] ss:$0 sm:$0xff] }
 0xdd5   :  { %v1703_v2 = vsel %vm1701_vm15, %v1702_v62, %v1700_v63  ;;  %1805 = vmatpush.msrb.mxu2 %v949_v56 }
 0xdd6   :  { %v1716_v3 = vadd.f32 1e-06, %v1703_v2 }
 0xdd8   :  { %2189 = vrcp.f32 %v1716_v3  ;;  %v1729_v9 = vand.u32 2147483648, %v1716_v3  ;;  %v1727_v39 = vand.u32 2147483647, %v1716_v3  ;;  %vm1723_vm2 = vweird.f32 %v1716_v3 }
 0xdda   :  { %v1730_v16 = vor.u32 1.1754944e-38, %v1729_v9  ;;  %vm1728_vm8 = vcmp.eq.f32.partialorder %v1727_v39, 8.507059e+37 }
 0xdde   :  { %v2190_v5 = vpop.eup %2189 }
 0xddf   :  { %v1719_v6 = vmul.f32 %v2190_v5, %v1716_v3  ;;  %vm1724_vm1 = vweird.f32 %v2190_v5 }
 0xde0   :  { %vm1725_vm7 = vmor %vm1723_vm2, %vm1724_vm1 }
 0xde1   :  { %v1720_v7 = vsub.f32 1.0, %v1719_v6 }
 0xde3   :  { %v1686_v12 = vpop.xlane.xlu2 %1685  ;;  %v1721_v13 = vmul.f32 %v2190_v5, %v1720_v7 }
 0xde4   :  { %v1688_v14 = vmul.f32 0.032258064, %v1686_v12 }
 0xde5   :  { %v1722_v15 = vadd.f32 %v2190_v5, %v1721_v13 }
 0xde6   :  { %2191 = vrsqrt.f32 %v1688_v14  ;;  %vm1711_vm9 = vcmp.eq.f32.partialorder %v1688_v14, inf  ;;  %v1714_v36 = vand.u32 2147483648, %v1688_v14  ;;  %vm1713_vm10 = vcmp.eq.f32.partialorder %v1688_v14, 0.0 }
 0xde7   :  { %v1726_v19 = vsel %vm1725_vm7, %v2190_v5, %v1722_v15 }
 0xde8   :  { %v1731_v23 = vsel %vm1728_vm8, %v1730_v16, %v1726_v19 }
 0xde9   :  { %v1732_v24 = vmul.f32 %v1731_v23, %v1690_v43 }
 0xdeb   :  { %v1749_v25 = vadd.f32 %v2091_v17, %v1732_v24 }
 0xdec   :  { %v2192_v26 = vpop.eup %2191 }
 0xded   :  { %v1705_v27 = vmul.f32 %v2192_v26, %v1688_v14  ;;  %2033 = vmatmul.msk.f32.vlgmr.msrb.gmra.mxu1 %vm74_vm0, %v1749_v25 }
 0xdef   :  { %v1706_v28 = vmul.f32 %v2192_v26, %v1705_v27 }
 0xdf1   :  { %v1707_v29 = vmul.f32 0.5, %v1706_v28 }
 0xdf3   :  { %v1708_v32 = vsub.f32 1.5, %v1707_v29 }
 0xdf5   :  { %v1709_v34 = vmul.f32 %v2192_v26, %v1708_v32 }
 0xdf7   :  { %v1710_v20 = vmul.f32 %v1709_v34, %v1688_v14  ;;  %v1819_v34 = vld [vmem:[#allocation6 + $0x160] sm:$0xff] }
 0xdf8   :  { %1946 = vmatpush.msrb.mxu3 %v1819_v34 }
 0xdf9   :  { %v1712_v40 = vsel %vm1711_vm9, %v1688_v14, %v1710_v20  ;;  %v1817_v20 = vld [vmem:[#allocation6 + $0x150] sm:$0xff] }
 0xdfa   :  { %v1715_v41 = vsel %vm1713_vm10, %v1714_v36, %v1712_v40  ;;  %1947 = vmatpush.msrb.mxu3 %v1818_v35 }
 0xdfb   :  { %v1717_v42 = vadd.f32 1e-06, %v1715_v41 }
 0xdfc   :  { %1948 = vmatpush.msrb.mxu3 %v1817_v20 }
 0xdfd   :  { %2193 = vrcp.f32 %v1717_v42  ;;  %v1744_v0 = vand.u32 2147483648, %v1717_v42  ;;  %v1742_v47 = vand.u32 2147483647, %v1717_v42  ;;  %vm1738_vm12 = vweird.f32 %v1717_v42 }
 0xdff   :  { %v1745_v22 = vor.u32 1.1754944e-38, %v1744_v0  ;;  %vm1743_vm3 = vcmp.eq.f32.partialorder %v1742_v47, 8.507059e+37 }
 0xe03   :  { %v2194_v44 = vpop.eup %2193 }
 0xe04   :  { %v1734_v45 = vmul.f32 %v2194_v44, %v1717_v42  ;;  %vm1739_vm11 = vweird.f32 %v2194_v44 }
 0xe05   :  { %vm1740_vm13 = vmor %vm1738_vm12, %vm1739_vm11 }
 0xe06   :  { %v1735_v46 = vsub.f32 1.0, %v1734_v45 }
 0xe08   :  { %v1736_v4 = vmul.f32 %v2194_v44, %v1735_v46 }
 0xe0a   :  { %v1737_v48 = vadd.f32 %v2194_v44, %v1736_v4 }
 0xe0c   :  { %v1741_v50 = vsel %vm1740_vm13, %v2194_v44, %v1737_v48  ;;  %vm1927_vm13 = vcmask 1040384  }
 0xe0d   :  { %v1746_v51 = vsel %vm1743_vm3, %v1745_v22, %v1741_v50  ;;  %vm1953_vm3 = vcmask 123904  }
 0xe0e   :  { %v1747_v52 = vmul.f32 %v1746_v51, %v1691_v8  ;;  %v2094_v51 = vld [vmem:[#allocation6 + $0x170] ss:$0 sm:$0xff] }
 0xe10   :  { %v1750_v53 = vadd.f32 %v2091_v17, %v1747_v52 }
 0xe12   :  { %2034 = vmatmul.msk.f32.gmra.mxu1 %vm74_vm0, %v1750_v53 }
 0xe6a   :  { %v1775_v57 = vpop.f32.mrf.mxu1 }
 0xe6b   :  { %v1776_v58 = vadd.f32 %v2092_v18, %v1775_v57 }
 0xe6d   :  { %v1781_v59 = vmax.f32 %v1776_v58, 0.0 }
 0xe6f   :  { %2035 = vmatmul.msk.f32.vlgmr.msrb.gmra.mxu2 %vm905_vm4, %v1781_v59 }
 0xe8f   :  { %v1778_v1 = vpop.f32.mrf.mxu1 }
 0xe90   :  { %v1779_v60 = vadd.f32 %v2092_v18, %v1778_v1 }
 0xe92   :  { %v1782_v49 = vmax.f32 %v1779_v60, 0.0  ;;  %v2095_v60 = vld [vmem:[#allocation6 + $0x171] ss:$0 sm:$0xff] }
 0xe94   :  { %2036 = vmatmul.msk.f32.gmra.mxu2 %vm905_vm4, %v1782_v49 }
 0xef2   :  { %v1807_v62 = vpop.f32.mrf.mxu2 }
 0xef3   :  { %v1808_v63 = vadd.f32 %v2093_v61, %v1807_v62  ;;  %v2301_v62 = vmov 8.0  }
 0xef5   :  { %v1813_v2 = vadd.f32 %v1808_v63, %v2655_v38 }
 0xef7   :  { %v1822_v3 = vsel %vm74_vm0, %v1813_v2, 0.0 }
 0xef8   :  { %1823 = vadd.xlane.f32.xlu0 %v1822_v3 }
 0xf17   :  { %v1810_v5 = vpop.f32.mrf.mxu2 }
 0xf18   :  { %v1811_v6 = vadd.f32 %v2093_v61, %v1810_v5 }
 0xf1a   :  { %v1814_v7 = vadd.f32 %v1811_v6, %v2660_v21 }
 0xf1c   :  { %v1825_v9 = vsel %vm74_vm0, %v1814_v7, 0.0 }
 0xf1d   :  { %1826 = vadd.xlane.f32.xlu2 %v1825_v9 }
 0xf6b   :  { %v1824_v11 = vpop.xlane.xlu0 %1823 }
 0xf6c   :  { %v1828_v12 = vmul.f32 %v1824_v11, %v2334_v10 }
 0xf6e   :  { %v2684_v13 = vsub.f32 %v1813_v2, %v1828_v12 }
 0xf70   :  { %v1832_v39 = vmul.f32 %v2684_v13, %v2684_v13  ;;  %v1843_v57 = vmul.f32 %v2094_v51, %v2684_v13 }
 0xf72   :  { %v1834_v38 = vsel %vm74_vm0, %v1832_v39, 0.0 }
 0xf73   :  { %1835 = vadd.xlane.f32.xlu0 %v1834_v38 }
 0xf90   :  { %v1827_v14 = vpop.xlane.xlu2 %1826 }
 0xf91   :  { %v1829_v15 = vmul.f32 %v1827_v14, %v2334_v10 }
 0xf93   :  { %v2690_v16 = vsub.f32 %v1814_v7, %v1829_v15 }
 0xf95   :  { %v1833_v21 = vmul.f32 %v2690_v16, %v2690_v16  ;;  %v1844_v38 = vmul.f32 %v2094_v51, %v2690_v16 }
 0xf97   :  { %v1837_v43 = vsel %vm74_vm0, %v1833_v21, 0.0 }
 0xf98   :  { %1838 = vadd.xlane.f32.xlu2 %v1837_v43 }
 0xfe6   :  { %v1836_v19 = vpop.xlane.xlu0 %1835 }
 0xfe7   :  { %v1840_v17 = vmul.f32 0.032258064, %v1836_v19 }
 0xfe9   :  { %2195 = vrsqrt.f32 %v1840_v17  ;;  %vm1852_vm4 = vcmp.eq.f32.partialorder %v1840_v17, inf  ;;  %v1855_v30 = vand.u32 2147483648, %v1840_v17  ;;  %vm1854_vm5 = vcmp.eq.f32.partialorder %v1840_v17, 0.0 }
 0xfef   :  { %v2196_v23 = vpop.eup %2195 }
 0xff0   :  { %v1846_v24 = vmul.f32 %v2196_v23, %v1840_v17 }
 0xff2   :  { %v1847_v25 = vmul.f32 %v2196_v23, %v1846_v24 }
 0xff4   :  { %v1848_v26 = vmul.f32 0.5, %v1847_v25 }
 0xff6   :  { %v1849_v27 = vsub.f32 1.5, %v1848_v26 }
 0xff8   :  { %v1850_v28 = vmul.f32 %v2196_v23, %v1849_v27 }
 0xffa   :  { %v1851_v29 = vmul.f32 %v1850_v28, %v1840_v17 }
 0xffc   :  { %v1853_v10 = vsel %vm1852_vm4, %v1840_v17, %v1851_v29 }
 0xffd   :  { %v1856_v31 = vsel %vm1854_vm5, %v1855_v30, %v1853_v10 }
 0xffe   :  { %v1869_v32 = vadd.f32 1e-06, %v1856_v31 }
0x1000   :  { %2197 = vrcp.f32 %v1869_v32  ;;  %v1882_v22 = vand.u32 2147483648, %v1869_v32  ;;  %vm1876_vm14 = vweird.f32 %v1869_v32  ;;  %v1880_v8 = vand.u32 2147483647, %v1869_v32 }
0x1002   :  { %v1883_v54 = vor.u32 1.1754944e-38, %v1882_v22  ;;  %vm1881_vm2 = vcmp.eq.f32.partialorder %v1880_v8, 8.507059e+37 }
0x1006   :  { %v2198_v36 = vpop.eup %2197 }
0x1007   :  { %v1872_v41 = vmul.f32 %v2198_v36, %v1869_v32  ;;  %vm1877_vm6 = vweird.f32 %v2198_v36 }
0x1008   :  { %vm1878_vm15 = vmor %vm1876_vm14, %vm1877_vm6 }
0x1009   :  { %v1873_v42 = vsub.f32 1.0, %v1872_v41 }
0x100b   :  { %v1839_v37 = vpop.xlane.xlu2 %1838  ;;  %v1874_v46 = vmul.f32 %v2198_v36, %v1873_v42 }
0x100c   :  { %v1841_v40 = vmul.f32 0.032258064, %v1839_v37  ;;  %v2096_v37 = vld [vmem:[#allocation6 + $0x172] ss:$0 sm:$0xff] }
0x100d   :  { %v1875_v47 = vadd.f32 %v2198_v36, %v1874_v46 }
0x100e   :  { %2199 = vrsqrt.f32 %v1841_v40  ;;  %vm1864_vm1 = vcmp.eq.f32.partialorder %v1841_v40, inf  ;;  %v1867_v55 = vand.u32 2147483648, %v1841_v40  ;;  %vm1866_vm7 = vcmp.eq.f32.partialorder %v1841_v40, 0.0 }
0x100f   :  { %v1879_v52 = vsel %vm1878_vm15, %v2198_v36, %v1875_v47 }
0x1010   :  { %v1884_v18 = vsel %vm1881_vm2, %v1883_v54, %v1879_v52 }
0x1011   :  { %v1885_v1 = vmul.f32 %v1884_v18, %v1843_v57 }
0x1013   :  { %v1902_v49 = vadd.f32 %v2095_v60, %v1885_v1 }
0x1014   :  { %v2200_v44 = vpop.eup %2199 }
0x1015   :  { %v1858_v45 = vmul.f32 %v2200_v44, %v1841_v40  ;;  %v1904_v2 = vsel %vm74_vm0, %v1902_v49, 0.0 }
0x1016   :  { %v1905_v6 = vrot.slane %v1904_v2, 4 }
0x1017   :  { %v1859_v0 = vmul.f32 %v2200_v44, %v1858_v45 }
0x1018   :  { %v1906_v39 = vadd.f32 %v1905_v6, %v1904_v2 }
0x1019   :  { %v1860_v4 = vmul.f32 0.5, %v1859_v0 }
0x101a   :  { %v1907_v19 = vrot.slane %v1906_v39, 2 }
0x101b   :  { %v1861_v48 = vsub.f32 1.5, %v1860_v4 }
0x101c   :  { %v1908_v25 = vadd.f32 %v1907_v19, %v1906_v39 }
0x101d   :  { %v1862_v50 = vmul.f32 %v2200_v44, %v1861_v48 }
0x101e   :  { %v1909_v29 = vrot.slane %v1908_v25, 1 }
0x101f   :  { %v1863_v53 = vmul.f32 %v1862_v50, %v1841_v40 }
0x1020   :  { %v1910_v16 = vadd.f32 %v1909_v29, %v1908_v25 }
0x1021   :  { %v1865_v56 = vsel %vm1864_vm1, %v1841_v40, %v1863_v53 }
0x1022   :  { %v1868_v58 = vsel %vm1866_vm7, %v1867_v55, %v1865_v56 }
0x1023   :  { %v1870_v59 = vadd.f32 1e-06, %v1868_v58 }
0x1025   :  { %2201 = vrcp.f32 %v1870_v59  ;;  %v1897_v5 = vand.u32 2147483648, %v1870_v59  ;;  %v1895_v9 = vand.u32 2147483647, %v1870_v59  ;;  %vm1891_vm9 = vweird.f32 %v1870_v59 }
0x1026   :  { %2203 = vrcp.f32 %v2301_v62 }
0x1027   :  { %v1898_v13 = vor.u32 1.1754944e-38, %v1897_v5  ;;  %vm1896_vm11 = vcmp.eq.f32.partialorder %v1895_v9, 8.507059e+37 }
0x102b   :  { %v2202_v61 = vpop.eup %2201 }
0x102c   :  { %v1887_v63 = vmul.f32 %v2202_v61, %v1870_v59  ;;  %vm1892_vm8 = vweird.f32 %v2202_v61  ;;  %v2204_v11 = vpop.eup %2203 }
0x102d   :  { %vm1893_vm10 = vmor %vm1891_vm9, %vm1892_vm8  ;;  %v1912_v15 = vmul.f32 8.0, %v2204_v11  ;;  %vm1916_vm12 = vweird.f32 %v2204_v11 }
0x102e   :  { %v1888_v3 = vsub.f32 1.0, %v1887_v63 }
0x102f   :  { %v1913_v23 = vsub.f32 1.0, %v1912_v15 }
0x1030   :  { %v1889_v7 = vmul.f32 %v2202_v61, %v1888_v3 }
0x1031   :  { %v1914_v27 = vmul.f32 %v2204_v11, %v1913_v23 }
0x1032   :  { %v1890_v12 = vadd.f32 %v2202_v61, %v1889_v7 }
0x1033   :  { %v1915_v30 = vadd.f32 %v2204_v11, %v1914_v27 }
0x1034   :  { %v1894_v14 = vsel %vm1893_vm10, %v2202_v61, %v1890_v12 }
0x1035   :  { %v1899_v21 = vsel %vm1896_vm11, %v1898_v13, %v1894_v14  ;;  %v1917_v33 = vsel %vm1916_vm12, %v2204_v11, %v1915_v30 }
0x1036   :  { %v1900_v43 = vmul.f32 %v1899_v21, %v1844_v38  ;;  %v1918_v35 = vmul.f32 %v1917_v33, %v1910_v16 }
0x1038   :  { %v1903_v17 = vadd.f32 %v2095_v60, %v1900_v43 }
0x103a   :  { %v1919_v24 = vsel %vm74_vm0, %v1903_v17, 0.0 }
0x103b   :  { %v1920_v26 = vrot.slane %v1919_v24, 4 }
0x103d   :  { %v1921_v28 = vadd.f32 %v1920_v26, %v1919_v24 }
0x103f   :  { %v1922_v10 = vrot.slane %v1921_v28, 2 }
0x1041   :  { %v1923_v31 = vadd.f32 %v1922_v10, %v1921_v28 }
0x1043   :  { %v1924_v32 = vrot.slane %v1923_v31, 1 }
0x1045   :  { %v1925_v34 = vadd.f32 %v1924_v32, %v1923_v31 }
0x1047   :  { %v1926_v20 = vmul.f32 %v1925_v34, %v1917_v33 }
0x1049   :  { %v1928_v36 = vsel %vm1927_vm13, %v1918_v35, %v1926_v20 }
0x104a   :  { %2037 = vmatmul.msk.f32.vlgmr.msrb.gmra.mxu3 %vm74_vm0, %v1928_v36 }
0x10cd   :  { %v1950_v40 = vpop.f32.mrf.mxu3 }
0x10ce   :  { %v1951_v41 = vadd.f32 %v2096_v37, %v1950_v40 }
0x10d0   :  { %1954 = vst.msk [vmem:[#allocation8] sm:$0x3] %vm1953_vm3, %v1951_v41 }
0x10d1   :  { %1965 = dma.vmem_to_hbm [thread:$0]  %s1961_s5, 32, %s1963_s8, [#allocation5]  }
0x10d2   :  { %2281 = dma.done.wait [#allocation5], 32  }
0x10d3   :  { %2282 = vsyncadd [#allocation5], 4294967264 }
0x10d4   :  { %1970 = vsyncpa [#allocation4], 1 }
0x10d5   :  { %1971 = vsyncpa [#allocation7], 1 }
0x10d6   :  { %1972 = vsyncpa [#allocation5], 1 }

</bundles_post_ra>
